<compile_context>
chip_gen: v5e
topology: v5e:2x2
jax: 0.10.0
libtpu: 0.0.40
codegen_flags: <defaults>
</compile_context>

<pallas_src>
import jax
import jax.numpy as jnp
from jax.experimental import pallas as pl
from jax.experimental.pallas import tpu as pltpu

# ---------------------------------------------------------------------------
# Model dimensions ('deep' variant)
# ---------------------------------------------------------------------------
IN_FEATURES = 15
LAYER_DIMS = [15, 128, 256, 512, 256, 128, 1]   # 6 Linear layers

TB_MAX = 2048     # max batch-tile rows: big enough to amortize grid overhead
                  # on v5e/v6e, small enough for v7x's 64 MiB per-TC VMEM
ROW_ALIGN = 16    # bf16 sublane packing
MIN_TILES = 2     # prefer >= 2 grid steps so v7x megacore uses both TCs

# True MAC count per row (layer 1 contracts over K=15, not a padded 128).
_MACS_PER_ROW = sum(LAYER_DIMS[i] * LAYER_DIMS[i + 1]
                    for i in range(len(LAYER_DIMS) - 1))   # = 329,728


def _cdiv(a, b):
    return -(-a // b)


def _round_up(n, m):
    return _cdiv(n, m) * m


# ---------------------------------------------------------------------------
# Pallas kernel: full MLP forward for one batch tile of TB rows.
# ---------------------------------------------------------------------------
def _mlp_kernel(x_ref,
                w1_ref, b1_ref, w2_ref, b2_ref, w3_ref, b3_ref,
                w4_ref, b4_ref, w5_ref, b5_ref, w6_ref, b6_ref,
                o_ref):
    # Layer 1: direct K=15 contraction (Mosaic pads the tile internally) --
    # no VMEM scratch, no masked lane store, no zero-row MXU work.
    x = x_ref[...].astype(jnp.bfloat16)                      # [TB, 15]
    h = jnp.dot(x, w1_ref[...], preferred_element_type=jnp.float32)
    h = jnp.maximum(h + b1_ref[...], 0.0).astype(jnp.bfloat16)   # [TB, 128]

    def dense_relu_bf16(h, w_ref, b_ref):
        y = jnp.dot(h, w_ref[...], preferred_element_type=jnp.float32)
        y = jnp.maximum(y + b_ref[...], 0.0)                 # bias/ReLU in f32
        return y.astype(jnp.bfloat16)

    # Layers 2..4 (Dropout = identity at inference).
    h = dense_relu_bf16(h, w2_ref, b2_ref)                   # [TB, 256]
    h = dense_relu_bf16(h, w3_ref, b3_ref)                   # [TB, 512]
    h = dense_relu_bf16(h, w4_ref, b4_ref)                   # [TB, 256]

    # Layer 5: keep the activation in f32 for the final VPU reduction.
    h5 = jnp.dot(h, w5_ref[...], preferred_element_type=jnp.float32)
    h5 = jnp.maximum(h5 + b5_ref[...], 0.0)                  # [TB, 128] f32

    # Layer 6 (128 -> 1) + Sigmoid: elementwise mul + lane reduce instead of a
    # 1-wide MXU matmul.
    logits = jnp.sum(h5 * w6_ref[...], axis=-1, keepdims=True) + b6_ref[...]
    o_ref[...] = jax.nn.sigmoid(logits)                      # [TB, 1] f32
    # TODO(synk): optional lane-dense (1, TB) output layout (modest win; kernel
    # is MXU-bound) and fp8/int8 for the 256/512-wide layers if accuracy allows.


# ---------------------------------------------------------------------------
# One-time parameter prep (hoisted out of the per-call path).
# ---------------------------------------------------------------------------
def prepare_params(params):
    """params: list of (W [in,out], b [out]) for the 6 layers (float32).
    Returns the tuple of pre-converted operands the kernel expects."""
    (w1, b1), (w2, b2), (w3, b3), (w4, b4), (w5, b5), (w6, b6) = params

    # bf16 weights for the MXU (w1 stays [15, 128] -- no zero padding needed);
    # w6 as a [1, 128] f32 row for the in-kernel VPU reduction; biases as
    # [1, N] f32 rows.
    w1b, w2b, w3b, w4b, w5b = (w.astype(jnp.bfloat16)
                               for w in (w1, w2, w3, w4, w5))
    w6row = w6.astype(jnp.float32).reshape(1, LAYER_DIMS[5])
    b1r, b2r, b3r, b4r, b5r = (b.astype(jnp.float32).reshape(1, -1)
                               for b in (b1, b2, b3, b4, b5))
    b6r = b6.astype(jnp.float32).reshape(1, 1)
    return (w1b, b1r, w2b, b2r, w3b, b3r, w4b, b4r, w5b, b5r, w6row, b6r)


# ---------------------------------------------------------------------------
# Wrapper: batch tiling + pallas_call setup.
# ---------------------------------------------------------------------------
def classifier_forward(x, prepared_params):
    """x: [B, 15] float32.  prepared_params: output of prepare_params().
    Returns y_hat: [B, 1] float32 (matches Classifier.forward at eval time)."""
    x = x.astype(jnp.float32)
    B = x.shape[0]
    assert x.shape[1] == IN_FEATURES

    if B == 0:                                   # empty-batch guard
        return jnp.zeros((0, 1), jnp.float32)

    # Tile selection: spread B over n_tiles so padding never approaches a full
    # extra tile, and prefer >= MIN_TILES grid steps (v7x megacore) when B is
    # large enough to split.
    n_tiles = max(MIN_TILES, _cdiv(B, TB_MAX))
    n_tiles = min(n_tiles, max(1, _cdiv(B, ROW_ALIGN)))
    TB = _round_up(_cdiv(B, n_tiles), ROW_ALIGN)
    n_tiles = _cdiv(B, TB)
    B_pad = n_tiles * TB

    if B_pad == B:
        x_in = x
    else:
        x_in = jnp.zeros((B_pad, IN_FEATURES), jnp.float32).at[:B].set(x)

    def batch_map(i):    # x / output: walk the batch tiles
        return (i, 0)

    def whole_map(i):    # weights / biases: single block, VMEM-resident
        return (0, 0)

    in_specs = [pl.BlockSpec((TB, IN_FEATURES), batch_map)]
    in_specs += [pl.BlockSpec(op.shape, whole_map) for op in prepared_params]

    param_bytes = sum(int(op.size) * op.dtype.itemsize for op in prepared_params)
    cost = pl.CostEstimate(
        flops=2 * B_pad * _MACS_PER_ROW,
        transcendentals=B_pad,                           # one sigmoid per row
        bytes_accessed=B_pad * (IN_FEATURES * 4 + 4) + param_bytes,
    )

    out = pl.pallas_call(
        _mlp_kernel,
        out_shape=jax.ShapeDtypeStruct((B_pad, 1), jnp.float32),
        grid=(n_tiles,),
        in_specs=in_specs,
        out_specs=pl.BlockSpec((TB, 1), batch_map),
        compiler_params=pltpu.CompilerParams(
            dimension_semantics=("parallel",),   # megacore-shardable batch axis
            vmem_limit_bytes=48 * 1024 * 1024),  # safe on v7x (64 MiB/TC) too
        cost_estimate=cost,
    )(x_in, *prepared_params)

    return out[:B]      # drop batch padding rows -> [B, 1]


# ---------------------------------------------------------------------------
# Deterministic parameter init (mimics nn.Linear default: U(-1/sqrt(fan_in), .)).
# ---------------------------------------------------------------------------
def init_params(key):
    params = []
    for li in range(len(LAYER_DIMS) - 1):
        fan_in, fan_out = LAYER_DIMS[li], LAYER_DIMS[li + 1]
        key, kw, kb = jax.random.split(key, 3)
        bound = 1.0 / jnp.sqrt(float(fan_in))
        w = jax.random.uniform(kw, (fan_in, fan_out), jnp.float32, -bound, bound)
        b = jax.random.uniform(kb, (fan_out,), jnp.float32, -bound, bound)
        params.append((w, b))
    return params


# Pure-JAX f32 reference for correctness checks.
def reference_forward(x, params):
    h = x
    for i, (w, b) in enumerate(params):
        h = h @ w + b
        if i < len(params) - 1:
            h = jnp.maximum(h, 0.0)
    return jax.nn.sigmoid(h)


if __name__ == "__main__":
    key = jax.random.PRNGKey(0)
    key, kx1, kx2 = jax.random.split(key, 3)

    params = init_params(key)
    prepared = prepare_params(params)      # one-time prep, hoisted out of fwd
    fwd = jax.jit(classifier_forward)

    # Small single-tile batch.
    x1 = jax.random.normal(kx1, (8, IN_FEATURES), jnp.float32)
    y1 = jax.block_until_ready(fwd(x1, prepared))
    assert y1.shape == (8, 1), y1.shape
    err1 = jnp.max(jnp.abs(y1 - reference_forward(x1, params)))
    assert err1 < 3e-2, f"max abs err (B=8) = {err1}"

    # Non-aligned batch exercising the multi-tile / padding path (2 grid steps).
    x2 = jax.random.normal(kx2, (40, IN_FEATURES), jnp.float32)
    y2 = jax.block_until_ready(fwd(x2, prepared))
    assert y2.shape == (40, 1), y2.shape
    err2 = jnp.max(jnp.abs(y2 - reference_forward(x2, params)))
    assert err2 < 3e-2, f"max abs err (B=40) = {err2}"

    print("KERNEL_OK")
</pallas_src>

<mosaic_0001>
module attributes {stable_mosaic.version = 11 : i64} {
  func.func @_mlp_kernel(%arg0: i32, %arg1: memref<16x15xf32, #tpu.memory_space<vmem>>, %arg2: memref<15x128xbf16, #tpu.memory_space<vmem>>, %arg3: memref<1x128xf32, #tpu.memory_space<vmem>>, %arg4: memref<128x256xbf16, #tpu.memory_space<vmem>>, %arg5: memref<1x256xf32, #tpu.memory_space<vmem>>, %arg6: memref<256x512xbf16, #tpu.memory_space<vmem>>, %arg7: memref<1x512xf32, #tpu.memory_space<vmem>>, %arg8: memref<512x256xbf16, #tpu.memory_space<vmem>>, %arg9: memref<1x256xf32, #tpu.memory_space<vmem>>, %arg10: memref<256x128xbf16, #tpu.memory_space<vmem>>, %arg11: memref<1x128xf32, #tpu.memory_space<vmem>>, %arg12: memref<1x128xf32, #tpu.memory_space<vmem>>, %arg13: memref<1x1xf32, #tpu.memory_space<vmem>>, %arg14: memref<16x1xf32, #tpu.memory_space<vmem>>) attributes {dimension_semantics = [#tpu.dimension_semantics<parallel>], iteration_bounds = array<i64: 1>, scalar_prefetch = 0 : i64, scratch_operands = 0 : i64, tpu.core_type = #tpu.core_type<tc>, window_params = [{transform_indices = @transform_0, window_bounds = array<i64: 16, 15>}, {pipeline_mode = #tpu.pipeline_mode<synchronous>, transform_indices = @transform_1, window_bounds = array<i64: 15, 128>}, {pipeline_mode = #tpu.pipeline_mode<synchronous>, transform_indices = @transform_2, window_bounds = array<i64: 1, 128>}, {pipeline_mode = #tpu.pipeline_mode<synchronous>, transform_indices = @transform_3, window_bounds = array<i64: 128, 256>}, {pipeline_mode = #tpu.pipeline_mode<synchronous>, transform_indices = @transform_4, window_bounds = array<i64: 1, 256>}, {pipeline_mode = #tpu.pipeline_mode<synchronous>, transform_indices = @transform_5, window_bounds = array<i64: 256, 512>}, {pipeline_mode = #tpu.pipeline_mode<synchronous>, transform_indices = @transform_6, window_bounds = array<i64: 1, 512>}, {pipeline_mode = #tpu.pipeline_mode<synchronous>, transform_indices = @transform_7, window_bounds = array<i64: 512, 256>}, {pipeline_mode = #tpu.pipeline_mode<synchronous>, transform_indices = @transform_8, window_bounds = array<i64: 1, 256>}, {pipeline_mode = #tpu.pipeline_mode<synchronous>, transform_indices = @transform_9, window_bounds = array<i64: 256, 128>}, {pipeline_mode = #tpu.pipeline_mode<synchronous>, transform_indices = @transform_10, window_bounds = array<i64: 1, 128>}, {pipeline_mode = #tpu.pipeline_mode<synchronous>, transform_indices = @transform_11, window_bounds = array<i64: 1, 128>}, {pipeline_mode = #tpu.pipeline_mode<synchronous>, transform_indices = @transform_12, window_bounds = array<i64: 1, 1>}, {transform_indices = @transform_13, window_bounds = array<i64: 16, 1>}]} {
    %c0 = arith.constant 0 : index
    %c0_0 = arith.constant 0 : index
    %0 = vector.load %arg1[%c0, %c0_0] : memref<16x15xf32, #tpu.memory_space<vmem>>, vector<16x15xf32>
    %1 = arith.truncf %0 : vector<16x15xf32> to vector<16x15xbf16>
    %c0_1 = arith.constant 0 : index
    %c0_2 = arith.constant 0 : index
    %2 = vector.load %arg2[%c0_1, %c0_2] : memref<15x128xbf16, #tpu.memory_space<vmem>>, vector<15x128xbf16>
    %cst = arith.constant dense<0.000000e+00> : vector<16x128xf32>
    %3 = tpu.matmul %1, %2, %cst {dimension_numbers = #tpu.dot_dimension_numbers<[1], [0], [0], [1], [0, 0, 1, 1], [], []>} : vector<16x15xbf16>, vector<15x128xbf16>, vector<16x128xf32> -> vector<16x128xf32>
    %c0_3 = arith.constant 0 : index
    %c0_4 = arith.constant 0 : index
    %4 = vector.load %arg3[%c0_3, %c0_4] : memref<1x128xf32, #tpu.memory_space<vmem>>, vector<1x128xf32>
    %5 = vector.broadcast %4 : vector<1x128xf32> to vector<16x128xf32>
    %6 = arith.addf %3, %5 : vector<16x128xf32>
    %cst_5 = arith.constant 0.000000e+00 : f32
    %7 = vector.broadcast %cst_5 : f32 to vector<16x128xf32>
    %8 = arith.maximumf %6, %7 : vector<16x128xf32>
    %9 = arith.truncf %8 : vector<16x128xf32> to vector<16x128xbf16>
    %c0_6 = arith.constant 0 : index
    %c0_7 = arith.constant 0 : index
    %10 = vector.load %arg4[%c0_6, %c0_7] : memref<128x256xbf16, #tpu.memory_space<vmem>>, vector<128x256xbf16>
    %cst_8 = arith.constant dense<0.000000e+00> : vector<16x256xf32>
    %11 = tpu.matmul %9, %10, %cst_8 {dimension_numbers = #tpu.dot_dimension_numbers<[1], [0], [0], [1], [0, 0, 1, 1], [], []>} : vector<16x128xbf16>, vector<128x256xbf16>, vector<16x256xf32> -> vector<16x256xf32>
    %c0_9 = arith.constant 0 : index
    %c0_10 = arith.constant 0 : index
    %12 = vector.load %arg5[%c0_9, %c0_10] : memref<1x256xf32, #tpu.memory_space<vmem>>, vector<1x256xf32>
    %13 = vector.broadcast %12 : vector<1x256xf32> to vector<16x256xf32>
    %14 = arith.addf %11, %13 : vector<16x256xf32>
    %cst_11 = arith.constant 0.000000e+00 : f32
    %15 = vector.broadcast %cst_11 : f32 to vector<16x256xf32>
    %16 = arith.maximumf %14, %15 : vector<16x256xf32>
    %17 = arith.truncf %16 : vector<16x256xf32> to vector<16x256xbf16>
    %c0_12 = arith.constant 0 : index
    %c0_13 = arith.constant 0 : index
    %18 = vector.load %arg6[%c0_12, %c0_13] : memref<256x512xbf16, #tpu.memory_space<vmem>>, vector<256x512xbf16>
    %cst_14 = arith.constant dense<0.000000e+00> : vector<16x512xf32>
    %19 = tpu.matmul %17, %18, %cst_14 {dimension_numbers = #tpu.dot_dimension_numbers<[1], [0], [0], [1], [0, 0, 1, 1], [], []>} : vector<16x256xbf16>, vector<256x512xbf16>, vector<16x512xf32> -> vector<16x512xf32>
    %c0_15 = arith.constant 0 : index
    %c0_16 = arith.constant 0 : index
    %20 = vector.load %arg7[%c0_15, %c0_16] : memref<1x512xf32, #tpu.memory_space<vmem>>, vector<1x512xf32>
    %21 = vector.broadcast %20 : vector<1x512xf32> to vector<16x512xf32>
    %22 = arith.addf %19, %21 : vector<16x512xf32>
    %cst_17 = arith.constant 0.000000e+00 : f32
    %23 = vector.broadcast %cst_17 : f32 to vector<16x512xf32>
    %24 = arith.maximumf %22, %23 : vector<16x512xf32>
    %25 = arith.truncf %24 : vector<16x512xf32> to vector<16x512xbf16>
    %c0_18 = arith.constant 0 : index
    %c0_19 = arith.constant 0 : index
    %26 = vector.load %arg8[%c0_18, %c0_19] : memref<512x256xbf16, #tpu.memory_space<vmem>>, vector<512x256xbf16>
    %cst_20 = arith.constant dense<0.000000e+00> : vector<16x256xf32>
    %27 = tpu.matmul %25, %26, %cst_20 {dimension_numbers = #tpu.dot_dimension_numbers<[1], [0], [0], [1], [0, 0, 1, 1], [], []>} : vector<16x512xbf16>, vector<512x256xbf16>, vector<16x256xf32> -> vector<16x256xf32>
    %c0_21 = arith.constant 0 : index
    %c0_22 = arith.constant 0 : index
    %28 = vector.load %arg9[%c0_21, %c0_22] : memref<1x256xf32, #tpu.memory_space<vmem>>, vector<1x256xf32>
    %29 = vector.broadcast %28 : vector<1x256xf32> to vector<16x256xf32>
    %30 = arith.addf %27, %29 : vector<16x256xf32>
    %cst_23 = arith.constant 0.000000e+00 : f32
    %31 = vector.broadcast %cst_23 : f32 to vector<16x256xf32>
    %32 = arith.maximumf %30, %31 : vector<16x256xf32>
    %33 = arith.truncf %32 : vector<16x256xf32> to vector<16x256xbf16>
    %c0_24 = arith.constant 0 : index
    %c0_25 = arith.constant 0 : index
    %34 = vector.load %arg10[%c0_24, %c0_25] : memref<256x128xbf16, #tpu.memory_space<vmem>>, vector<256x128xbf16>
    %cst_26 = arith.constant dense<0.000000e+00> : vector<16x128xf32>
    %35 = tpu.matmul %33, %34, %cst_26 {dimension_numbers = #tpu.dot_dimension_numbers<[1], [0], [0], [1], [0, 0, 1, 1], [], []>} : vector<16x256xbf16>, vector<256x128xbf16>, vector<16x128xf32> -> vector<16x128xf32>
    %c0_27 = arith.constant 0 : index
    %c0_28 = arith.constant 0 : index
    %36 = vector.load %arg11[%c0_27, %c0_28] : memref<1x128xf32, #tpu.memory_space<vmem>>, vector<1x128xf32>
    %37 = vector.broadcast %36 : vector<1x128xf32> to vector<16x128xf32>
    %38 = arith.addf %35, %37 : vector<16x128xf32>
    %cst_29 = arith.constant 0.000000e+00 : f32
    %39 = vector.broadcast %cst_29 : f32 to vector<16x128xf32>
    %40 = arith.maximumf %38, %39 : vector<16x128xf32>
    %c0_30 = arith.constant 0 : index
    %c0_31 = arith.constant 0 : index
    %41 = vector.load %arg12[%c0_30, %c0_31] : memref<1x128xf32, #tpu.memory_space<vmem>>, vector<1x128xf32>
    %42 = vector.broadcast %41 : vector<1x128xf32> to vector<16x128xf32>
    %43 = arith.mulf %40, %42 : vector<16x128xf32>
    %cst_32 = arith.constant dense<0.000000e+00> : vector<16xf32>
    %44 = vector.multi_reduction <add>, %43, %cst_32 [1] : vector<16x128xf32> to vector<16xf32>
    %45 = vector.shape_cast %44 : vector<16xf32> to vector<16x1xf32>
    %c0_33 = arith.constant 0 : index
    %c0_34 = arith.constant 0 : index
    %46 = vector.load %arg13[%c0_33, %c0_34] : memref<1x1xf32, #tpu.memory_space<vmem>>, vector<1x1xf32>
    %47 = vector.broadcast %46 : vector<1x1xf32> to vector<16x1xf32>
    %48 = arith.addf %45, %47 : vector<16x1xf32>
    %49 = arith.negf %48 : vector<16x1xf32>
    %50 = math.exp %49 : vector<16x1xf32>
    %cst_35 = arith.constant 1.000000e+00 : f32
    %51 = vector.broadcast %cst_35 : f32 to vector<16x1xf32>
    %52 = arith.addf %51, %50 : vector<16x1xf32>
    %53 = arith.divf %51, %52 : vector<16x1xf32>
    %c0_36 = arith.constant 0 : index
    %c0_37 = arith.constant 0 : index
    %54 = vector.load %arg14[%c0_36, %c0_37] : memref<16x1xf32, #tpu.memory_space<vmem>>, vector<16x1xf32>
    tpu.vector_store %arg14[%c0_36, %c0_37], %53 {strides = array<i32>} : memref<16x1xf32, #tpu.memory_space<vmem>>, vector<16x1xf32>,
    return
  }
  func.func @transform_0(%arg0: i32) -> (i32, i32) {
    %c0_i32 = arith.constant 0 : i32
    %c0_i32_0 = arith.constant 0 : i32
    return %arg0, %c0_i32 : i32, i32
  }
  func.func @transform_1(%arg0: i32) -> (i32, i32) {
    %c0_i32 = arith.constant 0 : i32
    %c0_i32_0 = arith.constant 0 : i32
    %c0_i32_1 = arith.constant 0 : i32
    return %c0_i32, %c0_i32_0 : i32, i32
  }
  func.func @transform_2(%arg0: i32) -> (i32, i32) {
    %c0_i32 = arith.constant 0 : i32
    %c0_i32_0 = arith.constant 0 : i32
    %c0_i32_1 = arith.constant 0 : i32
    return %c0_i32, %c0_i32_0 : i32, i32
  }
  func.func @transform_3(%arg0: i32) -> (i32, i32) {
    %c0_i32 = arith.constant 0 : i32
    %c0_i32_0 = arith.constant 0 : i32
    %c0_i32_1 = arith.constant 0 : i32
    return %c0_i32, %c0_i32_0 : i32, i32
  }
  func.func @transform_4(%arg0: i32) -> (i32, i32) {
    %c0_i32 = arith.constant 0 : i32
    %c0_i32_0 = arith.constant 0 : i32
    %c0_i32_1 = arith.constant 0 : i32
    return %c0_i32, %c0_i32_0 : i32, i32
  }
  func.func @transform_5(%arg0: i32) -> (i32, i32) {
    %c0_i32 = arith.constant 0 : i32
    %c0_i32_0 = arith.constant 0 : i32
    %c0_i32_1 = arith.constant 0 : i32
    return %c0_i32, %c0_i32_0 : i32, i32
  }
  func.func @transform_6(%arg0: i32) -> (i32, i32) {
    %c0_i32 = arith.constant 0 : i32
    %c0_i32_0 = arith.constant 0 : i32
    %c0_i32_1 = arith.constant 0 : i32
    return %c0_i32, %c0_i32_0 : i32, i32
  }
  func.func @transform_7(%arg0: i32) -> (i32, i32) {
    %c0_i32 = arith.constant 0 : i32
    %c0_i32_0 = arith.constant 0 : i32
    %c0_i32_1 = arith.constant 0 : i32
    return %c0_i32, %c0_i32_0 : i32, i32
  }
  func.func @transform_8(%arg0: i32) -> (i32, i32) {
    %c0_i32 = arith.constant 0 : i32
    %c0_i32_0 = arith.constant 0 : i32
    %c0_i32_1 = arith.constant 0 : i32
    return %c0_i32, %c0_i32_0 : i32, i32
  }
  func.func @transform_9(%arg0: i32) -> (i32, i32) {
    %c0_i32 = arith.constant 0 : i32
    %c0_i32_0 = arith.constant 0 : i32
    %c0_i32_1 = arith.constant 0 : i32
    return %c0_i32, %c0_i32_0 : i32, i32
  }
  func.func @transform_10(%arg0: i32) -> (i32, i32) {
    %c0_i32 = arith.constant 0 : i32
    %c0_i32_0 = arith.constant 0 : i32
    %c0_i32_1 = arith.constant 0 : i32
    return %c0_i32, %c0_i32_0 : i32, i32
  }
  func.func @transform_11(%arg0: i32) -> (i32, i32) {
    %c0_i32 = arith.constant 0 : i32
    %c0_i32_0 = arith.constant 0 : i32
    %c0_i32_1 = arith.constant 0 : i32
    return %c0_i32, %c0_i32_0 : i32, i32
  }
  func.func @transform_12(%arg0: i32) -> (i32, i32) {
    %c0_i32 = arith.constant 0 : i32
    %c0_i32_0 = arith.constant 0 : i32
    %c0_i32_1 = arith.constant 0 : i32
    return %c0_i32, %c0_i32_0 : i32, i32
  }
  func.func @transform_13(%arg0: i32) -> (i32, i32) {
    %c0_i32 = arith.constant 0 : i32
    %c0_i32_0 = arith.constant 0 : i32
    return %arg0, %c0_i32 : i32, i32
  }
}

</mosaic_0001>

<bundles_post_ra>
// kernel: classifier_forward.1
= control target key start
LH: loop header
LB: loop body
LE: loop exit
PB: predicated region body
PF: predicated region fallthrough
CT: control target
= control target key end

     0   :  { %s2610_s0 = inlined_call_operand.vmem [shape: f32[16,15], index: 0, kind: input, shape index: {}]   ;;  %s2611_s1 = inlined_call_operand.vmem [shape: bf16[15,128], index: 1, kind: input, shape index: {}]   ;;  %s2612_s2 = inlined_call_operand.vmem [shape: f32[1,128], index: 2, kind: input, shape index: {}]   ;;  %s2613_s3 = inlined_call_operand.hbm [shape: bf16[128,256], index: 3, kind: input, shape index: {}]   ;;  %s2614_s4 = inlined_call_operand.vmem [shape: f32[1,256], index: 4, kind: input, shape index: {}]   ;;  %s2615_s5 = inlined_call_operand.hbm [shape: bf16[256,512], index: 5, kind: input, shape index: {}]   ;;  %s2616_s6 = inlined_call_operand.vmem [shape: f32[1,512], index: 6, kind: input, shape index: {}]   ;;  %s2617_s7 = inlined_call_operand.hbm [shape: bf16[512,256], index: 7, kind: input, shape index: {}]   ;;  %s2618_s8 = inlined_call_operand.vmem [shape: f32[1,256], index: 8, kind: input, shape index: {}]   ;;  %s2619_s9 = inlined_call_operand.hbm [shape: bf16[256,128], index: 9, kind: input, shape index: {}]   ;;  %s2620_s10 = inlined_call_operand.vmem [shape: f32[1,128], index: 10, kind: input, shape index: {}]   ;;  %s2621_s11 = inlined_call_operand.vmem [shape: f32[1,128], index: 11, kind: input, shape index: {}]   ;;  %s2622_s12 = inlined_call_operand.<no memory space> [shape: f32[1,1], index: 12, kind: input, shape index: {}]   ;;  %s2623_s13 = inlined_call_operand.vmem [shape: f32[16,1], index: 13, kind: output, shape index: {}]  }
   0x1   :  { %v18_v0 = vstv %s2622_s12 }
   0x2   :  { %19 = vst [vmem:[#allocation2] sm:$0x1] %v18_v0 }
   0x3   :  { %20 = vsyncpa [#allocation4], 0 }
   0x4   :  { %21 = vsyncpa [#allocation6], 0  ;;  %s48_s29 = sshll.u32 %s2615_s5, 4  ;;  %s49_s29 = int_to_ptr.hbm [resolvable:$true] %s48_s29 }
   0x5   :  { %22 = vsyncpa [#allocation9], 0  ;;  %s2473_s30 = smov [#allocation5]   ;;  %s33_s17 = sshll.u32 %s2613_s3, 4  ;;  %s34_s17 = int_to_ptr.hbm [resolvable:$true] %s33_s17 }
   0x6   :  { %s50_s14 = sshll.u32 %s2473_s30, 4  ;;  %s2474_s18 = smov 256   ;;  %s51_s14 = int_to_ptr.vmem [resolvable:$true] %s50_s14 }
   0x7   :  { %s2475_s19 = smov 16   ;;  %s2476_s12 = smov [#allocation3]  }
   0x8   :  { %56 = dma.hbm_to_vmem [thread:$0]  %s49_s29, 8192, %s51_s14, [#allocation6], %s2474_s18, %s2474_s18, %s2475_s19  }
   0x9   :  { %s35_s20 = sshll.u32 %s2476_s12, 4  ;;  %s2477_s21 = smov 128   ;;  %s36_s20 = int_to_ptr.vmem [resolvable:$true] %s35_s20 }
   0xa   :  { %s2478_s22 = smov 8   ;;  %s63_s24 = sshll.u32 %s2617_s7, 4  ;;  %s64_s24 = int_to_ptr.hbm [resolvable:$true] %s63_s24 }
   0xb   :  { %41 = dma.hbm_to_vmem [thread:$0]  %s34_s17, 2048, %s36_s20, [#allocation4], %s2477_s21, %s2477_s21, %s2478_s22  }
   0xc   :  { %s2479_s25 = smov [#allocation7]   ;;  %s78_s28 = sshll.u32 %s2619_s9, 4  ;;  %s79_s28 = int_to_ptr.hbm [resolvable:$true] %s78_s28 }
   0xd   :  { %s65_s26 = sshll.u32 %s2479_s25, 4  ;;  %s2480_s29 = smov [#allocation8]   ;;  %s66_s26 = int_to_ptr.vmem [resolvable:$true] %s65_s26 }
   0xe   :  { %71 = dma.hbm_to_vmem [thread:$0]  %s64_s24, 8192, %s66_s26, [#allocation6], %s2477_s21, %s2477_s21, %s2478_s22  }
   0xf   :  { %s80_s30 = sshll.u32 %s2480_s29, 4  ;;  %s2481_s14 = smov 64   ;;  %s81_s30 = int_to_ptr.vmem [resolvable:$true] %s80_s30 }
  0x10   :  { %s2482_s15 = smov 4  }
  0x11   :  { %86 = dma.hbm_to_vmem [thread:$0]  %s79_s28, 2048, %s81_s30, [#allocation9], %s2481_s14, %s2481_s14, %s2482_s15  }
  0x12   :  { %2467 = dma.done.wait [#allocation4], 2048  }
  0x13   :  { %2468 = vsyncadd [#allocation4], 4294965248 }
  0x14   :  { %2469 = dma.done.wait [#allocation6], 16384  }
  0x15   :  { %2470 = vsyncadd [#allocation6], 4294950912 }
  0x16   :  { %2471 = dma.done.wait [#allocation9], 2048  }
  0x17   :  { %2472 = vsyncadd [#allocation9], 4294965248  ;;  %vm128_vm0 = vcmask 1046528   ;;  %vm129_vm1 = vcmask 1047552   ;;  %v2483_v1 = vmov 65535   ;;  %v2187_v4 = vld [vmem:[%s2611_s1] sm:$0xff] }
  0x18   :  { %v130_v2 = vsel %vm128_vm0, 4294967295, %v2483_v1  ;;  %v110_v5 = vld [vmem:[%s2610_s0] sm:$0xff]  ;;  %v111_v6 = vld [vmem:[%s2610_s0 + $0x8] sm:$0xff]  ;;  %v1603_v7 = vld [vmem:[#allocation3 + $0x70] sm:$0xf]  ;;  %vm124_vm2 = vcmask 121856  }
  0x19   :  { %v131_v3 = vsel %vm129_vm1, %v130_v2, 0  ;;  %v2203_v8 = vld [vmem:[#allocation3 + $0x74] sm:$0xf0]  ;;  %v2202_v9 = vld [vmem:[#allocation3 + $0x74] sm:$0xf]  ;;  %v112_v15 = vpack.c.bf16 %v111_v6, %v110_v5  ;;  %vm1530_vm5 = vcmask 7168  }
  0x1a   :  { %v133_v10 = vand.u32 %v2187_v4, %v131_v3  ;;  %v1604_v11 = vor.u32 %v2203_v8, %v1603_v7  ;;  %v1605_v12 = vld [vmem:[#allocation3 + $0x78] sm:$0xf0]  ;;  %v1595_v13 = vld [vmem:[#allocation3 + $0x60] sm:$0xf]  ;;  %v2201_v14 = vld [vmem:[#allocation3 + $0x64] sm:$0xf0] }
  0x1b   :  { %v1608_v16 = vor.u32 %v2202_v9, %v1605_v12  ;;  %v2200_v17 = vld [vmem:[#allocation3 + $0x64] sm:$0xf]  ;;  %v1597_v18 = vld [vmem:[#allocation3 + $0x68] sm:$0xf0]  ;;  %v1596_v19 = vor.u32 %v2201_v14, %v1595_v13  ;;  %v1587_v21 = vld [vmem:[#allocation3 + $0x50] sm:$0xf] }
  0x1c   :  { %142 = vmatpush.bf16.msra.mxu0 %v133_v10  ;;  %254 = vmatpush.bf16.msra.mxu1 %v1604_v11  ;;  %v1600_v20 = vor.u32 %v2200_v17, %v1597_v18  ;;  %v2199_v22 = vld [vmem:[#allocation3 + $0x54] sm:$0xf0]  ;;  %v2198_v23 = vld [vmem:[#allocation3 + $0x54] sm:$0xf]  ;;  %v1589_v24 = vld [vmem:[#allocation3 + $0x58] sm:$0xf0] }
  0x1d   :  { %268 = vmatpush.bf16.msra.mxu2 %v1608_v16  ;;  %v1588_v25 = vor.u32 %v2199_v22, %v1587_v21  ;;  %v1592_v26 = vor.u32 %v2198_v23, %v1589_v24  ;;  %v1579_v27 = vld [vmem:[#allocation3 + $0x40] sm:$0xf]  ;;  %v2197_v28 = vld [vmem:[#allocation3 + $0x44] sm:$0xf0]  ;;  %v2196_v29 = vld [vmem:[#allocation3 + $0x44] sm:$0xf] }
  0x1e   :  { %v1581_v30 = vld [vmem:[#allocation3 + $0x48] sm:$0xf0]  ;;  %v1580_v31 = vor.u32 %v2197_v28, %v1579_v27  ;;  %v1571_v33 = vld [vmem:[#allocation3 + $0x30] sm:$0xf]  ;;  %v2195_v34 = vld [vmem:[#allocation3 + $0x34] sm:$0xf0] }
  0x1f   :  { %1544 = vmatmul.msk.bf16.vlgmr.msra.gmra.mxu0 %vm124_vm2, %v112_v15  ;;  %v1584_v32 = vor.u32 %v2196_v29, %v1581_v30  ;;  %v2194_v35 = vld [vmem:[#allocation3 + $0x34] sm:$0xf]  ;;  %v1572_v36 = vor.u32 %v2195_v34, %v1571_v33  ;;  %v1573_v37 = vld [vmem:[#allocation3 + $0x38] sm:$0xf0]  ;;  %v1563_v39 = vld [vmem:[#allocation3 + $0x20] sm:$0xf] }
  0x20   :  { %255 = vmatpush.bf16.msra.mxu1 %v1596_v19  ;;  %v1576_v38 = vor.u32 %v2194_v35, %v1573_v37  ;;  %v2193_v40 = vld [vmem:[#allocation3 + $0x24] sm:$0xf0]  ;;  %v2192_v41 = vld [vmem:[#allocation3 + $0x24] sm:$0xf]  ;;  %v1565_v43 = vld [vmem:[#allocation3 + $0x28] sm:$0xf0] }
  0x21   :  { %269 = vmatpush.bf16.msra.mxu2 %v1600_v20  ;;  %v1564_v42 = vor.u32 %v2193_v40, %v1563_v39  ;;  %v1568_v44 = vor.u32 %v2192_v41, %v1565_v43  ;;  %v1555_v45 = vld [vmem:[#allocation3 + $0x10] sm:$0xf]  ;;  %v2191_v46 = vld [vmem:[#allocation3 + $0x14] sm:$0xf0]  ;;  %v2190_v47 = vld [vmem:[#allocation3 + $0x14] sm:$0xf] }
  0x22   :  { %v1556_v48 = vor.u32 %v2191_v46, %v1555_v45  ;;  %v1557_v49 = vld [vmem:[#allocation3 + $0x18] sm:$0xf0]  ;;  %v1547_v51 = vld [vmem:[#allocation3] sm:$0xf]  ;;  %v2189_v52 = vld [vmem:[#allocation3 + $0x4] sm:$0xf0] }
  0x23   :  { %v1560_v50 = vor.u32 %v2190_v47, %v1557_v49  ;;  %v2188_v53 = vld [vmem:[#allocation3 + $0x4] sm:$0xf]  ;;  %v1548_v54 = vor.u32 %v2189_v52, %v1547_v51  ;;  %v1549_v55 = vld [vmem:[#allocation3 + $0x8] sm:$0xf0]  ;;  %v1723_v57 = vld [vmem:[#allocation5 + $0xe0] sm:$0xf] }
  0x24   :  { %256 = vmatpush.bf16.msra.mxu1 %v1588_v25  ;;  %v1552_v56 = vor.u32 %v2188_v53, %v1549_v55  ;;  %v2234_v58 = vld [vmem:[#allocation5 + $0xec] sm:$0xf0]  ;;  %v2232_v59 = vld [vmem:[#allocation5 + $0xe4] sm:$0xf]  ;;  %v1725_v61 = vld [vmem:[#allocation5 + $0xf0] sm:$0xf0] }
  0x25   :  { %270 = vmatpush.bf16.msra.mxu2 %v1592_v26  ;;  %v1724_v60 = vor.u32 %v2234_v58, %v1723_v57  ;;  %v1707_v62 = vld [vmem:[#allocation5 + $0xc0] sm:$0xf]  ;;  %v2230_v63 = vld [vmem:[#allocation5 + $0xcc] sm:$0xf0]  ;;  %v1728_v0 = vor.u32 %v2232_v59, %v1725_v61  ;;  %v2228_v1 = vld [vmem:[#allocation5 + $0xc4] sm:$0xf] }
  0x26   :  { %v1709_v2 = vld [vmem:[#allocation5 + $0xd0] sm:$0xf0]  ;;  %v1851_v3 = vld [vmem:[#allocation5 + $0x1e0] sm:$0xf]  ;;  %v1708_v4 = vor.u32 %v2230_v63, %v1707_v62  ;;  %v2266_v5 = vld [vmem:[#allocation5 + $0x1ec] sm:$0xf0] }
  0x27   :  { %682 = vmatpush.bf16.msra.mxu3 %v1724_v60  ;;  %v2264_v6 = vld [vmem:[#allocation5 + $0x1e4] sm:$0xf]  ;;  %v1853_v7 = vld [vmem:[#allocation5 + $0x1f0] sm:$0xf0]  ;;  %v1712_v8 = vor.u32 %v2228_v1, %v1709_v2  ;;  %v1852_v9 = vor.u32 %v2266_v5, %v1851_v3  ;;  %v1691_v11 = vld [vmem:[#allocation5 + $0xa0] sm:$0xf] }
  0x28   :  { %257 = vmatpush.bf16.msra.mxu1 %v1580_v31  ;;  %v1856_v10 = vor.u32 %v2264_v6, %v1853_v7  ;;  %v2226_v12 = vld [vmem:[#allocation5 + $0xac] sm:$0xf0]  ;;  %v2224_v13 = vld [vmem:[#allocation5 + $0xa4] sm:$0xf]  ;;  %v1693_v14 = vld [vmem:[#allocation5 + $0xb0] sm:$0xf0] }
  0x29   :  { %271 = vmatpush.bf16.msra.mxu2 %v1584_v32  ;;  %v1835_v15 = vld [vmem:[#allocation5 + $0x1c0] sm:$0xf]  ;;  %v2262_v16 = vld [vmem:[#allocation5 + $0x1cc] sm:$0xf0]  ;;  %696 = vmatpush.bf16.msrb.mxu0 %v1852_v9  ;;  %v2260_v18 = vld [vmem:[#allocation5 + $0x1c4] sm:$0xf]  ;;  %v1692_v20 = vor.u32 %v2226_v12, %v1691_v11  ;;  %v1696_v24 = vor.u32 %v2224_v13, %v1693_v14 }
  0x2a   :  { %v1836_v17 = vor.u32 %v2262_v16, %v1835_v15  ;;  %v1837_v19 = vld [vmem:[#allocation5 + $0x1d0] sm:$0xf0]  ;;  %v1675_v22 = vld [vmem:[#allocation5 + $0x80] sm:$0xf]  ;;  %v2222_v23 = vld [vmem:[#allocation5 + $0x8c] sm:$0xf0] }
  0x2b   :  { %683 = vmatpush.bf16.msra.mxu3 %v1708_v4  ;;  %v1840_v21 = vor.u32 %v2260_v18, %v1837_v19  ;;  %v1819_v25 = vld [vmem:[#allocation5 + $0x1a0] sm:$0xf]  ;;  %v2258_v26 = vld [vmem:[#allocation5 + $0x1ac] sm:$0xf0]  ;;  %v2256_v27 = vld [vmem:[#allocation5 + $0x1a4] sm:$0xf]  ;;  %v1676_v34 = vor.u32 %v2222_v23, %v1675_v22 }
  0x2c   :  { %258 = vmatpush.bf16.msra.mxu1 %v1572_v36  ;;  %v2220_v28 = vld [vmem:[#allocation5 + $0x84] sm:$0xf]  ;;  %v1677_v29 = vld [vmem:[#allocation5 + $0x90] sm:$0xf0]  ;;  %v1820_v31 = vor.u32 %v2258_v26, %v1819_v25  ;;  %v1803_v33 = vld [vmem:[#allocation5 + $0x180] sm:$0xf] }
  0x2d   :  { %272 = vmatpush.bf16.msra.mxu2 %v1576_v38  ;;  %v1821_v30 = vld [vmem:[#allocation5 + $0x1b0] sm:$0xf0]  ;;  %697 = vmatpush.bf16.msrb.mxu0 %v1836_v17  ;;  %v2254_v35 = vld [vmem:[#allocation5 + $0x18c] sm:$0xf0]  ;;  %v2252_v36 = vld [vmem:[#allocation5 + $0x184] sm:$0xf]  ;;  %v1680_v38 = vor.u32 %v2220_v28, %v1677_v29 }
  0x2e   :  { %v1824_v32 = vor.u32 %v2256_v27, %v1821_v30  ;;  %v1805_v37 = vld [vmem:[#allocation5 + $0x190] sm:$0xf0]  ;;  %v1659_v39 = vld [vmem:[#allocation5 + $0x60] sm:$0xf]  ;;  %v2218_v40 = vld [vmem:[#allocation5 + $0x6c] sm:$0xf0]  ;;  %v1804_v43 = vor.u32 %v2254_v35, %v1803_v33 }
  0x2f   :  { %684 = vmatpush.bf16.msra.mxu3 %v1692_v20  ;;  %v2216_v41 = vld [vmem:[#allocation5 + $0x64] sm:$0xf]  ;;  %v1787_v45 = vld [vmem:[#allocation5 + $0x160] sm:$0xf]  ;;  %v1660_v46 = vor.u32 %v2218_v40, %v1659_v39  ;;  %v2250_v47 = vld [vmem:[#allocation5 + $0x16c] sm:$0xf0] }
  0x30   :  { %259 = vmatpush.bf16.msra.mxu1 %v1564_v42  ;;  %v1661_v42 = vld [vmem:[#allocation5 + $0x70] sm:$0xf0]  ;;  %v1643_v51 = vld [vmem:[#allocation5 + $0x40] sm:$0xf]  ;;  %v2214_v52 = vld [vmem:[#allocation5 + $0x4c] sm:$0xf0] }
  0x31   :  { %273 = vmatpush.bf16.msra.mxu2 %v1568_v44  ;;  %698 = vmatpush.bf16.msrb.mxu0 %v1820_v31  ;;  %v1808_v44 = vor.u32 %v2252_v36, %v1805_v37  ;;  %v1789_v49 = vld [vmem:[#allocation5 + $0x170] sm:$0xf0]  ;;  %v1771_v58 = vld [vmem:[#allocation5 + $0x140] sm:$0xf]  ;;  %v1644_v59 = vor.u32 %v2214_v52, %v1643_v51  ;;  %v2246_v60 = vld [vmem:[#allocation5 + $0x14c] sm:$0xf0] }
  0x32   :  { %v1645_v55 = vld [vmem:[#allocation5 + $0x50] sm:$0xf0]  ;;  %v2244_v61 = vld [vmem:[#allocation5 + $0x144] sm:$0xf]  ;;  %v2359_v63 = vld [vmem:[%s2612_s2] ss:$0 sm:$0xff]  ;;  %v1772_v5 = vor.u32 %v2246_v60, %v1771_v58 }
  0x33   :  { %685 = vmatpush.bf16.msra.mxu3 %v1676_v34  ;;  %v1773_v62 = vld [vmem:[#allocation5 + $0x150] sm:$0xf0]  ;;  %v1627_v1 = vld [vmem:[#allocation5 + $0x20] sm:$0xf]  ;;  %v2210_v2 = vld [vmem:[#allocation5 + $0x2c] sm:$0xf0] }
  0x34   :  { %260 = vmatpush.bf16.msra.mxu1 %v1556_v48  ;;  %v2248_v48 = vld [vmem:[#allocation5 + $0x164] sm:$0xf]  ;;  %v1629_v4 = vld [vmem:[#allocation5 + $0x30] sm:$0xf0]  ;;  %v1776_v6 = vor.u32 %v2244_v61, %v1773_v62  ;;  %v1628_v7 = vor.u32 %v2210_v2, %v1627_v1  ;;  %v2206_v11 = vld [vmem:[#allocation5 + $0xc] sm:$0xf0] }
  0x35   :  { %274 = vmatpush.bf16.msra.mxu2 %v1560_v50  ;;  %v1664_v50 = vor.u32 %v2216_v41, %v1661_v42  ;;  %699 = vmatpush.bf16.msrb.mxu0 %v1804_v43  ;;  %v1792_v57 = vor.u32 %v2248_v48, %v1789_v49  ;;  %v2208_v3 = vld [vmem:[#allocation5 + $0x24] sm:$0xf]  ;;  %v1613_v15 = vld [vmem:[#allocation5 + $0x10] sm:$0xf0]  ;;  %v2235_v22 = vld [vmem:[#allocation5 + $0xf4] sm:$0xf0] }
  0x36   :  { %v1632_v9 = vor.u32 %v2208_v3, %v1629_v4  ;;  %v2204_v14 = vld [vmem:[#allocation5 + $0x4] sm:$0xf]  ;;  %v2233_v23 = vld [vmem:[#allocation5 + $0xec] sm:$0xf]  ;;  %v1733_v25 = vld [vmem:[#allocation5 + $0xf8] sm:$0xf0] }
  0x37   :  { %686 = vmatpush.bf16.msra.mxu3 %v1660_v46  ;;  %v1616_v19 = vor.u32 %v2204_v14, %v1613_v15  ;;  %v1755_v26 = vld [vmem:[#allocation5 + $0x120] sm:$0xf]  ;;  %v2242_v27 = vld [vmem:[#allocation5 + $0x12c] sm:$0xf0]  ;;  %v1736_v28 = vor.u32 %v2233_v23, %v1733_v25  ;;  %v2240_v30 = vld [vmem:[#allocation5 + $0x124] sm:$0xf] }
  0x38   :  { %261 = vmatpush.bf16.msra.mxu1 %v1548_v54  ;;  %v2212_v54 = vld [vmem:[#allocation5 + $0x44] sm:$0xf]  ;;  %v1756_v29 = vor.u32 %v2242_v27, %v1755_v26  ;;  %v1757_v31 = vld [vmem:[#allocation5 + $0x130] sm:$0xf0]  ;;  %v1715_v33 = vld [vmem:[#allocation5 + $0xc8] sm:$0xf] }
  0x39   :  { %275 = vmatpush.bf16.msra.mxu2 %v1552_v56  ;;  %v1788_v56 = vor.u32 %v2250_v47, %v1787_v45  ;;  %v2231_v34 = vld [vmem:[#allocation5 + $0xd4] sm:$0xf0]  ;;  %v2229_v35 = vld [vmem:[#allocation5 + $0xcc] sm:$0xf]  ;;  %v1717_v37 = vld [vmem:[#allocation5 + $0xd8] sm:$0xf0] }
  0x3a   :  { %v1716_v36 = vor.u32 %v2231_v34, %v1715_v33  ;;  %v2238_v39 = vld [vmem:[#allocation5 + $0x10c] sm:$0xf0]  ;;  %v1720_v40 = vor.u32 %v2229_v35, %v1717_v37  ;;  %v2236_v42 = vld [vmem:[#allocation5 + $0x104] sm:$0xf]  ;;  %v1741_v43 = vld [vmem:[#allocation5 + $0x110] sm:$0xf0] }
  0x3b   :  { %700 = vmatpush.bf16.msrb.mxu0 %v1788_v56  ;;  %687 = vmatpush.bf16.msra.mxu3 %v1644_v59  ;;  %v1859_v45 = vld [vmem:[#allocation5 + $0x1e8] sm:$0xf]  ;;  %v2267_v46 = vld [vmem:[#allocation5 + $0x1f4] sm:$0xf0]  ;;  %v2265_v47 = vld [vmem:[#allocation5 + $0x1ec] sm:$0xf] }
  0x3c   :  { %710 = vmatpush.bf16.msrb.mxu1 %v1728_v0  ;;  %v1648_v0 = vor.u32 %v2212_v54, %v1645_v55  ;;  %v1860_v48 = vor.u32 %v2267_v46, %v1859_v45  ;;  %v1861_v49 = vld [vmem:[#allocation5 + $0x1f8] sm:$0xf0]  ;;  %v2227_v51 = vld [vmem:[#allocation5 + $0xb4] sm:$0xf0]  ;;  %v2225_v54 = vld [vmem:[#allocation5 + $0xac] sm:$0xf] }
  0x3d   :  { %724 = vmatpush.bf16.msrb.mxu2 %v1856_v10  ;;  %v1611_v10 = vld [vmem:[#allocation5] sm:$0xf]  ;;  %v1864_v52 = vor.u32 %v2265_v47, %v1861_v49  ;;  %v1701_v55 = vld [vmem:[#allocation5 + $0xb8] sm:$0xf0]  ;;  %v2263_v58 = vld [vmem:[#allocation5 + $0x1d4] sm:$0xf0] }
  0x3e   :  { %v1612_v16 = vor.u32 %v2206_v11, %v1611_v10  ;;  %v1704_v56 = vor.u32 %v2225_v54, %v1701_v55  ;;  %v2261_v59 = vld [vmem:[#allocation5 + $0x1cc] sm:$0xf]  ;;  %v1845_v61 = vld [vmem:[#allocation5 + $0x1d8] sm:$0xf0]  ;;  %v1667_v11 = vld [vmem:[#allocation5 + $0x68] sm:$0xf] }
  0x3f   :  { %701 = vmatpush.bf16.msrb.mxu0 %v1772_v5  ;;  %688 = vmatpush.bf16.msra.mxu3 %v1628_v7  ;;  %v1848_v62 = vor.u32 %v2261_v59, %v1845_v61  ;;  %v2221_v1 = vld [vmem:[#allocation5 + $0x8c] sm:$0xf]  ;;  %v1685_v3 = vld [vmem:[#allocation5 + $0x98] sm:$0xf0]  ;;  %v1827_v5 = vld [vmem:[#allocation5 + $0x1a8] sm:$0xf] }
  0x40   :  { %711 = vmatpush.bf16.msrb.mxu1 %v1712_v8  ;;  %v1688_v4 = vor.u32 %v2221_v1, %v1685_v3  ;;  %v2257_v7 = vld [vmem:[#allocation5 + $0x1ac] sm:$0xf]  ;;  %v1669_v15 = vld [vmem:[#allocation5 + $0x78] sm:$0xf0]  ;;  %v1651_v23 = vld [vmem:[#allocation5 + $0x48] sm:$0xf] }
  0x41   :  { %725 = vmatpush.bf16.msrb.mxu2 %v1840_v21  ;;  %v1731_v21 = vld [vmem:[#allocation5 + $0xe8] sm:$0xf]  ;;  %v2213_v25 = vld [vmem:[#allocation5 + $0x4c] sm:$0xf]  ;;  %v1653_v27 = vld [vmem:[#allocation5 + $0x58] sm:$0xf0] }
  0x42   :  { %v1797_v33 = vld [vmem:[#allocation5 + $0x178] sm:$0xf0]  ;;  %v1635_v35 = vld [vmem:[#allocation5 + $0x28] sm:$0xf]  ;;  %v2209_v37 = vld [vmem:[#allocation5 + $0x2c] sm:$0xf] }
  0x43   :  { %689 = vmatpush.bf16.msra.mxu3 %v1612_v16  ;;  %702 = vmatpush.bf16.msrb.mxu0 %v1756_v29  ;;  %v1795_v29 = vld [vmem:[#allocation5 + $0x168] sm:$0xf]  ;;  %v1781_v45 = vld [vmem:[#allocation5 + $0x158] sm:$0xf0]  ;;  %v2205_v49 = vld [vmem:[#allocation5 + $0xc] sm:$0xf] }
  0x44   :  { %712 = vmatpush.bf16.msrb.mxu1 %v1696_v24  ;;  %v1732_v24 = vor.u32 %v2235_v22, %v1731_v21  ;;  %v1813_v21 = vld [vmem:[#allocation5 + $0x198] sm:$0xf0]  ;;  %v1619_v46 = vld [vmem:[#allocation5 + $0x8] sm:$0xf]  ;;  %v2243_v54 = vld [vmem:[#allocation5 + $0x134] sm:$0xf0] }
  0x45   :  { %726 = vmatpush.bf16.msrb.mxu2 %v1824_v32  ;;  %v1760_v32 = vor.u32 %v2240_v30, %v1757_v31  ;;  %v2251_v30 = vld [vmem:[#allocation5 + $0x174] sm:$0xf0]  ;;  %v2249_v31 = vld [vmem:[#allocation5 + $0x16c] sm:$0xf]  ;;  %v1747_v59 = vld [vmem:[#allocation5 + $0x108] sm:$0xf] }
  0x46   :  { %v1800_v34 = vor.u32 %v2249_v31, %v1797_v33  ;;  %v2241_v55 = vld [vmem:[#allocation5 + $0x12c] sm:$0xf]  ;;  %v1749_v1 = vld [vmem:[#allocation5 + $0x118] sm:$0xf0]  ;;  %v1907_v33 = vld [vmem:[#allocation7 + $0x50] sm:$0xf] }
  0x47   :  { %738 = vmatpush.bf16.msrb.mxu3 %v1732_v24  ;;  %v2215_v24 = vld [vmem:[#allocation5 + $0x54] sm:$0xf0]  ;;  %v2237_v61 = vld [vmem:[#allocation5 + $0x10c] sm:$0xf] }
  0x48   :  { %713 = vmatpush.bf16.msrb.mxu1 %v1680_v38  ;;  %v1739_v38 = vld [vmem:[#allocation5 + $0x100] sm:$0xf]  ;;  %v1652_v26 = vor.u32 %v2215_v24, %v1651_v23  ;;  %v1987_v23 = vld [vmem:[#allocation7 + $0xf0] sm:$0xf]  ;;  %v2313_v24 = vld [vmem:[#allocation7 + $0x164] sm:$0xf0] }
  0x49   :  { %727 = vmatpush.bf16.msrb.mxu2 %v1808_v44  ;;  %v1740_v41 = vor.u32 %v2238_v39, %v1739_v38  ;;  %v1744_v44 = vor.u32 %v2236_v42, %v1741_v43  ;;  %v1637_v39 = vld [vmem:[#allocation5 + $0x38] sm:$0xf0] }
  0x4a   :  { %v1640_v42 = vor.u32 %v2209_v37, %v1637_v39  ;;  %v2297_v39 = vld [vmem:[#allocation7 + $0xe4] sm:$0xf0] }
  0x4b   :  { %739 = vmatpush.bf16.msrb.mxu3 %v1716_v36  ;;  %703 = vmatpush.bf16.msrb.mxu0 %v1740_v41  ;;  %v2211_v36 = vld [vmem:[#allocation5 + $0x34] sm:$0xf0] }
  0x4c   :  { %714 = vmatpush.bf16.msrb.mxu1 %v1664_v50  ;;  %v1699_v50 = vld [vmem:[#allocation5 + $0xa8] sm:$0xf]  ;;  %v1636_v38 = vor.u32 %v2211_v36, %v1635_v35  ;;  %v2247_v41 = vld [vmem:[#allocation5 + $0x154] sm:$0xf0] }
  0x4d   :  { %728 = vmatpush.bf16.msrb.mxu2 %v1792_v57  ;;  %v1843_v57 = vld [vmem:[#allocation5 + $0x1c8] sm:$0xf] }
  0x4e   :  { %v1844_v60 = vor.u32 %v2263_v58, %v1843_v57 }
  0x4f   :  { %752 = vmatpush.bf16.msra.mxu0 %v1860_v48  ;;  %v2207_v48 = vld [vmem:[#allocation5 + $0x14] sm:$0xf0] }
  0x50   :  { %715 = vmatpush.bf16.msrb.mxu1 %v1648_v0  ;;  %v2223_v0 = vld [vmem:[#allocation5 + $0x94] sm:$0xf0] }
  0x51   :  { %729 = vmatpush.bf16.msrb.mxu2 %v1776_v6  ;;  %v2259_v6 = vld [vmem:[#allocation5 + $0x1b4] sm:$0xf0] }
  0x53   :  { %753 = vmatpush.bf16.msra.mxu0 %v1844_v60  ;;  %v2239_v60 = vld [vmem:[#allocation5 + $0x114] sm:$0xf0] }
  0x54   :  { %716 = vmatpush.bf16.msrb.mxu1 %v1632_v9  ;;  %v1829_v9 = vld [vmem:[#allocation5 + $0x1b8] sm:$0xf0] }
  0x55   :  { %730 = vmatpush.bf16.msrb.mxu2 %v1760_v32  ;;  %v1832_v10 = vor.u32 %v2257_v7, %v1829_v9  ;;  %v1796_v32 = vor.u32 %v2251_v30, %v1795_v29  ;;  %v1923_v9 = vld [vmem:[#allocation7 + $0x70] sm:$0xf] }
  0x58   :  { %717 = vmatpush.bf16.msrb.mxu1 %v1616_v19  ;;  %v2253_v19 = vld [vmem:[#allocation5 + $0x18c] sm:$0xf] }
  0x59   :  { %731 = vmatpush.bf16.msrb.mxu2 %v1744_v44  ;;  %v1816_v22 = vor.u32 %v2253_v19, %v1813_v21  ;;  %v2245_v44 = vld [vmem:[#allocation5 + $0x14c] sm:$0xf]  ;;  %v2281_v19 = vld [vmem:[#allocation7 + $0x64] sm:$0xf0]  ;;  %v2043_v21 = vld [vmem:[#allocation7 + $0x160] sm:$0xf] }
  0x5a   :  { %v1784_v47 = vor.u32 %v2245_v44, %v1781_v45  ;;  %v2044_v30 = vor.u32 %v2313_v24, %v2043_v21  ;;  %v1971_v44 = vld [vmem:[#allocation7 + $0xd0] sm:$0xf]  ;;  %v2295_v45 = vld [vmem:[#allocation7 + $0xd4] sm:$0xf0]  ;;  %v1925_v21 = vld [vmem:[#allocation7 + $0x78] sm:$0xf0] }
  0x5b   :  { %v2285_v24 = vld [vmem:[#allocation7 + $0x84] sm:$0xf0] }
  0x9c   :  { %v144_v53 = vpop.f32.mrf.mxu0 }
  0x9d   :  { %v145_v8 = vadd.f32 %v2359_v63, %v144_v53  ;;  %v1700_v53 = vor.u32 %v2227_v51, %v1699_v50  ;;  %v1621_v50 = vld [vmem:[#allocation5 + $0x18] sm:$0xf0]  ;;  %v1620_v51 = vor.u32 %v2207_v48, %v1619_v46  ;;  %v2275_v48 = vld [vmem:[#allocation7 + $0x34] sm:$0xf0] }
  0x9f   :  { %v149_v17 = vmax.f32 %v145_v8, 0.0  ;;  %740 = vmatpush.bf16.msrb.mxu3 %v1700_v53  ;;  %v1828_v8 = vor.u32 %v2259_v6, %v1827_v5  ;;  %v1763_v53 = vld [vmem:[#allocation5 + $0x128] sm:$0xf] }
  0xa0   :  { %v1764_v57 = vor.u32 %v2243_v54, %v1763_v53  ;;  %v1883_v53 = vld [vmem:[#allocation7 + $0x20] sm:$0xf]  ;;  %v2273_v54 = vld [vmem:[#allocation7 + $0x24] sm:$0xf0] }
  0xa1   :  { %754 = vmatpush.bf16.msra.mxu0 %v1828_v8 }
  0xa4   :  { %v146_v12 = vpop.f32.mrf.mxu0 }
  0xa5   :  { %v147_v13 = vadd.f32 %v2359_v63, %v146_v12  ;;  %v1683_v63 = vld [vmem:[#allocation5 + $0x88] sm:$0xf]  ;;  %v2219_v12 = vld [vmem:[#allocation5 + $0x74] sm:$0xf0] }
  0xa6   :  { %v1684_v2 = vor.u32 %v2223_v0, %v1683_v63  ;;  %v1668_v14 = vor.u32 %v2219_v12, %v1667_v11  ;;  %v1748_v0 = vor.u32 %v2239_v60, %v1747_v59  ;;  %v1875_v60 = vld [vmem:[#allocation7 + $0x10] sm:$0xf] }
  0xa7   :  { %v150_v18 = vmax.f32 %v147_v13, 0.0  ;;  %v2217_v13 = vld [vmem:[#allocation5 + $0x6c] sm:$0xf] }
  0xa8   :  { %741 = vmatpush.bf16.msrb.mxu3 %v1684_v2  ;;  %v1672_v16 = vor.u32 %v2217_v13, %v1669_v15  ;;  %v1752_v2 = vor.u32 %v2237_v61, %v1749_v1  ;;  %v2051_v13 = vld [vmem:[#allocation7 + $0x170] sm:$0xf]  ;;  %v2315_v15 = vld [vmem:[#allocation7 + $0x174] sm:$0xf0] }
  0xa9   :  { %v151_v20 = vpack.c.bf16 %v150_v18, %v149_v17  ;;  %v1811_v17 = vld [vmem:[#allocation5 + $0x188] sm:$0xf]  ;;  %v2255_v18 = vld [vmem:[#allocation5 + $0x194] sm:$0xf0]  ;;  %v2035_v1 = vld [vmem:[#allocation7 + $0x150] sm:$0xf] }
  0xaa   :  { %v2271_v61 = vld [vmem:[#allocation7 + $0x14] sm:$0xf0] }
  0xab   :  { %262 = vmatmul.bf16.vlgmr.msra.gmra.mxu1 %v151_v20  ;;  %276 = vmatmul.bf16.vlgmr.msra.gmra.mxu2 %v151_v20  ;;  %v1812_v20 = vor.u32 %v2255_v18, %v1811_v17  ;;  %v1915_v18 = vld [vmem:[#allocation7 + $0x60] sm:$0xf] }
  0xac   :  { %766 = vmatpush.bf16.msra.mxu1 %v1736_v28  ;;  %780 = vmatpush.bf16.msra.mxu2 %v1864_v52  ;;  %v1656_v28 = vor.u32 %v2213_v25, %v1653_v27  ;;  %v1624_v52 = vor.u32 %v2205_v49, %v1621_v50  ;;  %v2115_v27 = vld [vmem:[#allocation7 + $0x1f0] sm:$0xf]  ;;  %v1916_v29 = vor.u32 %v2281_v19, %v1915_v18  ;;  %v1963_v50 = vld [vmem:[#allocation7 + $0xc0] sm:$0xf]  ;;  %v2327_v18 = vld [vmem:[#allocation7 + $0x1d4] sm:$0xf0] }
  0xad   :  { %742 = vmatpush.bf16.msrb.mxu3 %v1668_v14  ;;  %755 = vmatpush.bf16.msra.mxu0 %v1812_v20  ;;  %v2052_v20 = vor.u32 %v2315_v15, %v2051_v13  ;;  %v1972_v49 = vor.u32 %v2295_v45, %v1971_v44  ;;  %v2027_v13 = vld [vmem:[#allocation7 + $0x140] sm:$0xf]  ;;  %v2282_v19 = vld [vmem:[#allocation7 + $0x74] sm:$0xf]  ;;  %v1909_v44 = vld [vmem:[#allocation7 + $0x58] sm:$0xf0] }
  0xb0   :  { %767 = vmatpush.bf16.msra.mxu1 %v1720_v40  ;;  %781 = vmatpush.bf16.msra.mxu2 %v1848_v62  ;;  %v1779_v40 = vld [vmem:[#allocation5 + $0x148] sm:$0xf]  ;;  %v168_v62 = vld [vmem:[%s2614_s4] sm:$0x3] }
  0xb1   :  { %743 = vmatpush.bf16.msrb.mxu3 %v1652_v26  ;;  %756 = vmatpush.bf16.msra.mxu0 %v1796_v32  ;;  %v1780_v43 = vor.u32 %v2247_v41, %v1779_v40  ;;  %v170_v3 = vperm.slane %v168_v62, 0  ;;  %v171_v7 = vperm.slane %v168_v62, 1  ;;  %v2299_v26 = vld [vmem:[#allocation7 + $0xf4] sm:$0xf0]  ;;  %v1899_v41 = vld [vmem:[#allocation7 + $0x40] sm:$0xf] }
  0xb2   :  { %v1988_v35 = vor.u32 %v2299_v26, %v1987_v23  ;;  %v1947_v62 = vld [vmem:[#allocation7 + $0xa0] sm:$0xf] }
  0xb3   :  { %v1931_v23 = vld [vmem:[#allocation7 + $0x80] sm:$0xf] }
  0xb4   :  { %768 = vmatpush.bf16.msra.mxu1 %v1704_v56  ;;  %782 = vmatpush.bf16.msra.mxu2 %v1832_v10  ;;  %v1765_v56 = vld [vmem:[#allocation5 + $0x138] sm:$0xf0]  ;;  %v2283_v10 = vld [vmem:[#allocation7 + $0x74] sm:$0xf0]  ;;  %v1932_v26 = vor.u32 %v2285_v24, %v1931_v23 }
  0xb5   :  { %744 = vmatpush.bf16.msrb.mxu3 %v1636_v38  ;;  %757 = vmatpush.bf16.msra.mxu0 %v1780_v43  ;;  %v1768_v58 = vor.u32 %v2241_v55, %v1765_v56  ;;  %v1924_v14 = vor.u32 %v2283_v10, %v1923_v9  ;;  %v1979_v38 = vld [vmem:[#allocation7 + $0xe0] sm:$0xf]  ;;  %v1955_v56 = vld [vmem:[#allocation7 + $0xb0] sm:$0xf]  ;;  %v2269_v9 = vld [vmem:[#allocation7 + $0x4] sm:$0xf0] }
  0xb6   :  { %v1980_v43 = vor.u32 %v2297_v39, %v1979_v38  ;;  %v1939_v10 = vld [vmem:[#allocation7 + $0x90] sm:$0xf]  ;;  %v2011_v38 = vld [vmem:[#allocation7 + $0x120] sm:$0xf]  ;;  %v2305_v39 = vld [vmem:[#allocation7 + $0x124] sm:$0xf0] }
  0xb8   :  { %769 = vmatpush.bf16.msra.mxu1 %v1688_v4  ;;  %783 = vmatpush.bf16.msra.mxu2 %v1816_v22 }
  0xb9   :  { %745 = vmatpush.bf16.msrb.mxu3 %v1620_v51  ;;  %758 = vmatpush.bf16.msra.mxu0 %v1764_v57  ;;  %v2293_v51 = vld [vmem:[#allocation7 + $0xc4] sm:$0xf0]  ;;  %v2291_v57 = vld [vmem:[#allocation7 + $0xb4] sm:$0xf0] }
  0xba   :  { %v1964_v55 = vor.u32 %v2293_v51, %v1963_v50  ;;  %v1956_v59 = vor.u32 %v2291_v57, %v1955_v56  ;;  %v2003_v50 = vld [vmem:[#allocation7 + $0x110] sm:$0xf]  ;;  %v2303_v51 = vld [vmem:[#allocation7 + $0x114] sm:$0xf0]  ;;  %v1901_v56 = vld [vmem:[#allocation7 + $0x48] sm:$0xf0] }
  0xbc   :  { %770 = vmatpush.bf16.msra.mxu1 %v1672_v16  ;;  %784 = vmatpush.bf16.msra.mxu2 %v1800_v34  ;;  %v2279_v34 = vld [vmem:[#allocation7 + $0x54] sm:$0xf0] }
  0xbd   :  { %759 = vmatpush.bf16.msra.mxu0 %v1748_v0  ;;  %v1908_v40 = vor.u32 %v2279_v34, %v1907_v33  ;;  %v2289_v0 = vld [vmem:[#allocation7 + $0xa4] sm:$0xf0]  ;;  %v1917_v33 = vld [vmem:[#allocation7 + $0x68] sm:$0xf0]  ;;  %v2298_v34 = vld [vmem:[#allocation7 + $0xf4] sm:$0xf] }
  0xc0   :  { %771 = vmatpush.bf16.msra.mxu1 %v1656_v28  ;;  %785 = vmatpush.bf16.msra.mxu2 %v1784_v47  ;;  %v2331_v28 = vld [vmem:[#allocation7 + $0x1f4] sm:$0xf0]  ;;  %v1891_v47 = vld [vmem:[#allocation7 + $0x30] sm:$0xf] }
  0xc1   :  { %v2116_v36 = vor.u32 %v2331_v28, %v2115_v27  ;;  %v2307_v27 = vld [vmem:[#allocation7 + $0x134] sm:$0xf0]  ;;  %v2091_v28 = vld [vmem:[#allocation7 + $0x1c0] sm:$0xf] }
  0xc4   :  { %772 = vmatpush.bf16.msra.mxu1 %v1640_v42  ;;  %786 = vmatpush.bf16.msra.mxu2 %v1768_v58  ;;  %v2277_v42 = vld [vmem:[#allocation7 + $0x44] sm:$0xf0]  ;;  %v1884_v58 = vor.u32 %v2273_v54, %v1883_v53  ;;  %v2004_v53 = vor.u32 %v2303_v51, %v2003_v50  ;;  %v2326_v51 = vld [vmem:[#allocation7 + $0x1d4] sm:$0xf] }
  0xc5   :  { %v1900_v46 = vor.u32 %v2277_v42, %v1899_v41  ;;  %v2012_v41 = vor.u32 %v2305_v39, %v2011_v38  ;;  %v2323_v42 = vld [vmem:[#allocation7 + $0x1b4] sm:$0xf0]  ;;  %v2321_v54 = vld [vmem:[#allocation7 + $0x1a4] sm:$0xf0]  ;;  %v2109_v38 = vld [vmem:[#allocation7 + $0x1e8] sm:$0xf0] }
  0xc8   :  { %773 = vmatpush.bf16.msra.mxu1 %v1624_v52  ;;  %787 = vmatpush.bf16.msra.mxu2 %v1752_v2  ;;  %v1892_v52 = vor.u32 %v2275_v48, %v1891_v47  ;;  %v2311_v2 = vld [vmem:[#allocation7 + $0x154] sm:$0xf0]  ;;  %v2296_v47 = vld [vmem:[#allocation7 + $0xe4] sm:$0xf]  ;;  %v1981_v48 = vld [vmem:[#allocation7 + $0xe8] sm:$0xf0] }
 0x128   :  { %v263_v63 = vpop.f32.mrf.mxu1 }
 0x129   :  { %v264_v5 = vadd.f32 %v263_v63, %v170_v3  ;;  %v1876_v63 = vor.u32 %v2271_v61, %v1875_v60  ;;  %v1973_v60 = vld [vmem:[#allocation7 + $0xd8] sm:$0xf0] }
 0x12b   :  { %v282_v11 = vmax.f32 %v264_v5, 0.0  ;;  %v2107_v5 = vld [vmem:[#allocation7 + $0x1e0] sm:$0xf] }
 0x12e   :  { %v277_v4 = vpop.f32.mrf.mxu2 }
 0x12f   :  { %v278_v16 = vadd.f32 %v277_v4, %v171_v7  ;;  %v2036_v4 = vor.u32 %v2311_v2, %v2035_v1  ;;  %v2319_v2 = vld [vmem:[#allocation7 + $0x194] sm:$0xf0] }
 0x130   :  { %v265_v6 = vpop.f32.mrf.mxu1 }
 0x131   :  { %v266_v8 = vadd.f32 %v265_v6, %v170_v3  ;;  %v283_v31 = vmax.f32 %v278_v16, 0.0  ;;  %v1948_v3 = vor.u32 %v2289_v0, %v1947_v62  ;;  %v2329_v6 = vld [vmem:[#allocation7 + $0x1e4] sm:$0xf0]  ;;  %v1995_v62 = vld [vmem:[#allocation7 + $0x100] sm:$0xf] }
 0x132   :  { %v2067_v0 = vld [vmem:[#allocation7 + $0x190] sm:$0xf] }
 0x133   :  { %v284_v12 = vmax.f32 %v266_v8, 0.0  ;;  %v1867_v8 = vld [vmem:[#allocation7] sm:$0xf] }
 0x135   :  { %v286_v17 = vpack.c.bf16 %v284_v12, %v282_v11  ;;  %v1868_v11 = vor.u32 %v2269_v9, %v1867_v8  ;;  %v2287_v12 = vld [vmem:[#allocation7 + $0x94] sm:$0xf0] }
 0x136   :  { %v279_v22 = vpop.f32.mrf.mxu2  ;;  %v1940_v15 = vor.u32 %v2287_v12, %v1939_v10  ;;  %v2314_v10 = vld [vmem:[#allocation7 + $0x174] sm:$0xf] }
 0x137   :  { %v280_v25 = vadd.f32 %v279_v22, %v171_v7  ;;  %690 = vmatmul.bf16.vlgmr.msra.gmra.mxu3 %v286_v17  ;;  %718 = vmatmul.bf16.vlgmr.msrb.gmra.mxu1 %v286_v17  ;;  %v2108_v7 = vor.u32 %v2329_v6, %v2107_v5  ;;  %v1928_v22 = vor.u32 %v2282_v19, %v1925_v21  ;;  %v1893_v5 = vld [vmem:[#allocation7 + $0x38] sm:$0xf0]  ;;  %v2292_v6 = vld [vmem:[#allocation7 + $0xc4] sm:$0xf] }
 0x138   :  { %1196 = vmatpush.bf16.msra.mxu3 %v1924_v14  ;;  %1224 = vmatpush.bf16.msrb.mxu1 %v2052_v20  ;;  %v2309_v14 = vld [vmem:[#allocation7 + $0x144] sm:$0xf0]  ;;  %v2312_v21 = vld [vmem:[#allocation7 + $0x164] sm:$0xf] }
 0x139   :  { %v285_v32 = vmax.f32 %v280_v25, 0.0  ;;  %v2028_v16 = vor.u32 %v2309_v14, %v2027_v13  ;;  %v2019_v25 = vld [vmem:[#allocation7 + $0x130] sm:$0xf]  ;;  %v2059_v13 = vld [vmem:[#allocation7 + $0x180] sm:$0xf] }
 0x13a   :  { %v2317_v14 = vld [vmem:[#allocation7 + $0x184] sm:$0xf0] }
 0x13b   :  { %v287_v37 = vpack.c.bf16 %v285_v32, %v283_v31  ;;  %v2280_v32 = vld [vmem:[#allocation7 + $0x64] sm:$0xf] }
 0x13c   :  { %1197 = vmatpush.bf16.msra.mxu3 %v1916_v29  ;;  %1225 = vmatpush.bf16.msrb.mxu1 %v2044_v30  ;;  %v2325_v29 = vld [vmem:[#allocation7 + $0x1c4] sm:$0xf0]  ;;  %v2020_v30 = vor.u32 %v2307_v27, %v2019_v25  ;;  %v2330_v25 = vld [vmem:[#allocation7 + $0x1f4] sm:$0xf] }
 0x13d   :  { %704 = vmatmul.bf16.vlgmr.msrb.gmra.mxu0 %v287_v37  ;;  %732 = vmatmul.bf16.vlgmr.msrb.gmra.mxu2 %v287_v37  ;;  %v2092_v31 = vor.u32 %v2325_v29, %v2091_v28  ;;  %v2270_v28 = vld [vmem:[#allocation7 + $0x14] sm:$0xf]  ;;  %v1877_v29 = vld [vmem:[#allocation7 + $0x18] sm:$0xf0] }
 0x13e   :  { %1210 = vmatpush.bf16.msrb.mxu0 %v1988_v35  ;;  %1238 = vmatpush.bf16.msrb.mxu2 %v2116_v36  ;;  %v1920_v35 = vor.u32 %v2280_v32, %v1917_v33  ;;  %v1989_v36 = vld [vmem:[#allocation7 + $0xf8] sm:$0xf0]  ;;  %v1949_v32 = vld [vmem:[#allocation7 + $0xa8] sm:$0xf0]  ;;  %v2310_v33 = vld [vmem:[#allocation7 + $0x154] sm:$0xf] }
 0x140   :  { %1198 = vmatpush.bf16.msra.mxu3 %v1908_v40  ;;  %1226 = vmatpush.bf16.msrb.mxu1 %v2036_v4  ;;  %v2083_v40 = vld [vmem:[#allocation7 + $0x1b0] sm:$0xf]  ;;  %v2068_v4 = vor.u32 %v2319_v2, %v2067_v0  ;;  %v2304_v2 = vld [vmem:[#allocation7 + $0x124] sm:$0xf] }
 0x141   :  { %v2084_v45 = vor.u32 %v2323_v42, %v2083_v40  ;;  %v1869_v42 = vld [vmem:[#allocation7 + $0x8] sm:$0xf0] }
 0x142   :  { %1211 = vmatpush.bf16.msrb.mxu0 %v1980_v43  ;;  %1239 = vmatpush.bf16.msrb.mxu2 %v2108_v7  ;;  %v2278_v43 = vld [vmem:[#allocation7 + $0x54] sm:$0xf]  ;;  %v1965_v7 = vld [vmem:[#allocation7 + $0xc8] sm:$0xf0] }
 0x143   :  { %v1968_v9 = vor.u32 %v2292_v6, %v1965_v7  ;;  %v2085_v6 = vld [vmem:[#allocation7 + $0x1b8] sm:$0xf0] }
 0x144   :  { %1199 = vmatpush.bf16.msra.mxu3 %v1900_v46  ;;  %1227 = vmatpush.bf16.msrb.mxu1 %v2028_v16  ;;  %v1912_v46 = vor.u32 %v2278_v43, %v1909_v44  ;;  %v2272_v16 = vld [vmem:[#allocation7 + $0x24] sm:$0xf]  ;;  %v2286_v43 = vld [vmem:[#allocation7 + $0x94] sm:$0xf] }
 0x146   :  { %1212 = vmatpush.bf16.msrb.mxu0 %v1972_v49  ;;  %v1984_v49 = vor.u32 %v2296_v47, %v1981_v48  ;;  %v2029_v47 = vld [vmem:[#allocation7 + $0x148] sm:$0xf0]  ;;  %v2587_v48 = vld [vmem:[%s2616_s6] sm:$0xf] }
 0x147   :  { %746 = vmatmul.bf16.vlgmr.msrb.gmra.mxu3 %v286_v17  ;;  %774 = vmatmul.bf16.vlgmr.msra.gmra.mxu1 %v286_v17  ;;  %v2099_v17 = vld [vmem:[#allocation7 + $0x1d0] sm:$0xf] }
 0x148   :  { %1200 = vmatpush.bf16.msra.mxu3 %v1892_v52  ;;  %v2100_v20 = vor.u32 %v2327_v18, %v2099_v17  ;;  %1228 = vmatpush.bf16.msrb.mxu1 %v2020_v30  ;;  %v2075_v52 = vld [vmem:[#allocation7 + $0x1a0] sm:$0xf]  ;;  %v1885_v17 = vld [vmem:[#allocation7 + $0x28] sm:$0xf0]  ;;  %v2290_v18 = vld [vmem:[#allocation7 + $0xb4] sm:$0xf] }
 0x149   :  { %v2076_v57 = vor.u32 %v2321_v54, %v2075_v52  ;;  %v1888_v19 = vor.u32 %v2272_v16, %v1885_v17  ;;  %v2288_v30 = vld [vmem:[#allocation7 + $0xa4] sm:$0xf]  ;;  %v2101_v52 = vld [vmem:[#allocation7 + $0x1d8] sm:$0xf0] }
 0x14a   :  { %1213 = vmatpush.bf16.msrb.mxu0 %v1964_v55  ;;  %1240 = vmatpush.bf16.msrb.mxu2 %v2100_v20  ;;  %v2276_v55 = vld [vmem:[#allocation7 + $0x44] sm:$0xf]  ;;  %v1957_v20 = vld [vmem:[#allocation7 + $0xb8] sm:$0xf0]  ;;  %v2104_v54 = vor.u32 %v2326_v51, %v2101_v52 }
 0x14b   :  { %v1960_v23 = vor.u32 %v2290_v18, %v1957_v20 }
 0x14c   :  { %1201 = vmatpush.bf16.msra.mxu3 %v1884_v58  ;;  %1229 = vmatpush.bf16.msrb.mxu1 %v2012_v41  ;;  %v1904_v58 = vor.u32 %v2276_v55, %v1901_v56  ;;  %v2268_v41 = vld [vmem:[#allocation7 + $0x4] sm:$0xf]  ;;  %v1933_v56 = vld [vmem:[#allocation7 + $0x88] sm:$0xf0] }
 0x14d   :  { %760 = vmatmul.bf16.vlgmr.msra.gmra.mxu0 %v287_v37  ;;  %788 = vmatmul.bf16.vlgmr.msra.gmra.mxu2 %v287_v37  ;;  %v1992_v37 = vor.u32 %v2298_v34, %v1989_v36  ;;  %v2037_v34 = vld [vmem:[#allocation7 + $0x158] sm:$0xf0]  ;;  %v1872_v44 = vor.u32 %v2268_v41, %v1869_v42  ;;  %v2284_v55 = vld [vmem:[#allocation7 + $0x84] sm:$0xf] }
 0x14e   :  { %1214 = vmatpush.bf16.msrb.mxu0 %v1956_v59  ;;  %1241 = vmatpush.bf16.msrb.mxu2 %v2092_v31  ;;  %v2294_v59 = vld [vmem:[#allocation7 + $0xd4] sm:$0xf]  ;;  %v1880_v31 = vor.u32 %v2270_v28, %v1877_v29  ;;  %v2040_v36 = vor.u32 %v2310_v33, %v2037_v34 }
 0x14f   :  { %v1976_v61 = vor.u32 %v2294_v59, %v1973_v60  ;;  %v1936_v60 = vor.u32 %v2284_v55, %v1933_v56 }
 0x150   :  { %1202 = vmatpush.bf16.msra.mxu3 %v1876_v63  ;;  %1230 = vmatpush.bf16.msrb.mxu1 %v2004_v53  ;;  %v2301_v63 = vld [vmem:[#allocation7 + $0x104] sm:$0xf0]  ;;  %v354_v53 = vperm.slane %v2587_v48, 0 }
 0x151   :  { %v1996_v1 = vor.u32 %v2301_v63, %v1995_v62  ;;  %v2324_v62 = vld [vmem:[#allocation7 + $0x1c4] sm:$0xf]  ;;  %v2093_v63 = vld [vmem:[#allocation7 + $0x1c8] sm:$0xf0] }
 0x152   :  { %1215 = vmatpush.bf16.msrb.mxu0 %v1948_v3  ;;  %1242 = vmatpush.bf16.msrb.mxu2 %v2084_v45  ;;  %v2274_v3 = vld [vmem:[#allocation7 + $0x34] sm:$0xf]  ;;  %v1941_v45 = vld [vmem:[#allocation7 + $0x98] sm:$0xf0] }
 0x153   :  { %v1896_v8 = vor.u32 %v2274_v3, %v1893_v5  ;;  %v2013_v3 = vld [vmem:[#allocation7 + $0x128] sm:$0xf0] }
 0x154   :  { %1203 = vmatpush.bf16.msra.mxu3 %v1868_v11  ;;  %v2053_v11 = vld [vmem:[#allocation7 + $0x178] sm:$0xf0]  ;;  %1231 = vmatpush.bf16.msrb.mxu1 %v1996_v1  ;;  %v2096_v1 = vor.u32 %v2324_v62, %v2093_v63 }
 0x155   :  { %v2056_v12 = vor.u32 %v2314_v10, %v2053_v11  ;;  %v2302_v10 = vld [vmem:[#allocation7 + $0x114] sm:$0xf] }
 0x156   :  { %1216 = vmatpush.bf16.msrb.mxu0 %v1940_v15  ;;  %1243 = vmatpush.bf16.msrb.mxu2 %v2076_v57  ;;  %v2060_v15 = vor.u32 %v2317_v14, %v2059_v13  ;;  %v2306_v57 = vld [vmem:[#allocation7 + $0x134] sm:$0xf]  ;;  %v2320_v13 = vld [vmem:[#allocation7 + $0x1a4] sm:$0xf]  ;;  %v2077_v14 = vld [vmem:[#allocation7 + $0x1a8] sm:$0xf0] }
 0x158   :  { %1252 = vmatpush.bf16.msrb.mxu3 %v1928_v22  ;;  %v2045_v22 = vld [vmem:[#allocation7 + $0x168] sm:$0xf0]  ;;  %1280 = vmatpush.bf16.msra.mxu1 %v2056_v12  ;;  %v2005_v12 = vld [vmem:[#allocation7 + $0x118] sm:$0xf0] }
 0x159   :  { %v2048_v24 = vor.u32 %v2312_v21, %v2045_v22  ;;  %v2008_v20 = vor.u32 %v2302_v10, %v2005_v12  ;;  %v2080_v21 = vor.u32 %v2320_v13, %v2077_v14  ;;  %v2300_v22 = vld [vmem:[#allocation7 + $0x104] sm:$0xf]  ;;  %v2346_v10 = vld [vmem:[#allocation8 + $0x70] sm:$0xff]  ;;  %v2345_v12 = vld [vmem:[#allocation8 + $0x68] sm:$0xff] }
 0x15a   :  { %1217 = vmatpush.bf16.msrb.mxu0 %v1932_v26  ;;  %1244 = vmatpush.bf16.msrb.mxu2 %v2068_v4  ;;  %v2117_v26 = vld [vmem:[#allocation7 + $0x1f8] sm:$0xf0]  ;;  %v2322_v4 = vld [vmem:[#allocation7 + $0x1b4] sm:$0xf]  ;;  %v2332_v13 = vld [vmem:[#allocation8] sm:$0xff] }
 0x15b   :  { %v2120_v27 = vor.u32 %v2330_v25, %v2117_v26  ;;  %v2318_v26 = vld [vmem:[#allocation7 + $0x194] sm:$0xf]  ;;  %v2344_v14 = vld [vmem:[#allocation8 + $0x60] sm:$0xff] }
 0x15c   :  { %1253 = vmatpush.bf16.msrb.mxu3 %v1920_v35  ;;  %1281 = vmatpush.bf16.msra.mxu1 %v2048_v24  ;;  %v1952_v35 = vor.u32 %v2288_v30, %v1949_v32 }
 0x15e   :  { %1266 = vmatpush.bf16.msra.mxu0 %v1992_v37  ;;  %1245 = vmatpush.bf16.msrb.mxu2 %v2060_v15  ;;  %v2328_v37 = vld [vmem:[#allocation7 + $0x1e4] sm:$0xf]  ;;  %v355_v15 = vperm.slane %v2587_v48, 1 }
 0x15f   :  { %v2112_v39 = vor.u32 %v2328_v37, %v2109_v38  ;;  %v2316_v38 = vld [vmem:[#allocation7 + $0x184] sm:$0xf] }
 0x160   :  { %1254 = vmatpush.bf16.msrb.mxu3 %v1912_v46  ;;  %v2308_v46 = vld [vmem:[#allocation7 + $0x144] sm:$0xf]  ;;  %1282 = vmatpush.bf16.msra.mxu1 %v2040_v36 }
 0x161   :  { %v2032_v50 = vor.u32 %v2308_v46, %v2029_v47 }
 0x162   :  { %1267 = vmatpush.bf16.msra.mxu0 %v1984_v49  ;;  %1294 = vmatpush.bf16.msra.mxu2 %v2120_v27  ;;  %v1944_v49 = vor.u32 %v2286_v43, %v1941_v45  ;;  %v2069_v27 = vld [vmem:[#allocation7 + $0x198] sm:$0xf0] }
 0x163   :  { %v2072_v34 = vor.u32 %v2318_v26, %v2069_v27 }
 0x164   :  { %1255 = vmatpush.bf16.msrb.mxu3 %v1904_v58  ;;  %1283 = vmatpush.bf16.msra.mxu1 %v2032_v50  ;;  %v357_v50 = vperm.slane %v2587_v48, 3 }
 0x166   :  { %1268 = vmatpush.bf16.msra.mxu0 %v1976_v61  ;;  %1295 = vmatpush.bf16.msra.mxu2 %v2112_v39  ;;  %v2021_v61 = vld [vmem:[#allocation7 + $0x138] sm:$0xf0]  ;;  %v2061_v39 = vld [vmem:[#allocation7 + $0x188] sm:$0xf0] }
 0x167   :  { %v2024_v0 = vor.u32 %v2306_v57, %v2021_v61  ;;  %v2064_v45 = vor.u32 %v2316_v38, %v2061_v39 }
 0x168   :  { %1256 = vmatpush.bf16.msrb.mxu3 %v1896_v8  ;;  %v2016_v8 = vor.u32 %v2304_v2, %v2013_v3 }
 0x169   :  { %1284 = vmatpush.bf16.msra.mxu1 %v2024_v0 }
 0x16a   :  { %1269 = vmatpush.bf16.msra.mxu0 %v1968_v9  ;;  %1296 = vmatpush.bf16.msra.mxu2 %v2104_v54  ;;  %v2088_v9 = vor.u32 %v2322_v4, %v2085_v6  ;;  %v2338_v4 = vld [vmem:[#allocation8 + $0x30] sm:$0xff]  ;;  %v2336_v6 = vld [vmem:[#allocation8 + $0x20] sm:$0xff] }
 0x16c   :  { %1257 = vmatpush.bf16.msrb.mxu3 %v1888_v19 }
 0x16d   :  { %1285 = vmatpush.bf16.msra.mxu1 %v2016_v8  ;;  %v2347_v8 = vld [vmem:[#allocation8 + $0x78] sm:$0xff] }
 0x16e   :  { %1270 = vmatpush.bf16.msra.mxu0 %v1960_v23  ;;  %1297 = vmatpush.bf16.msra.mxu2 %v2096_v1  ;;  %v1997_v23 = vld [vmem:[#allocation7 + $0x108] sm:$0xf0] }
 0x16f   :  { %v2000_v32 = vor.u32 %v2300_v22, %v1997_v23  ;;  %v2340_v23 = vld [vmem:[#allocation8 + $0x40] sm:$0xff] }
 0x170   :  { %1258 = vmatpush.bf16.msrb.mxu3 %v1880_v31 }
 0x171   :  { %1286 = vmatpush.bf16.msra.mxu1 %v2008_v20  ;;  %v2341_v20 = vld [vmem:[#allocation8 + $0x48] sm:$0xff] }
 0x172   :  { %1271 = vmatpush.bf16.msra.mxu0 %v1952_v35  ;;  %1298 = vmatpush.bf16.msra.mxu2 %v2088_v9  ;;  %v2334_v9 = vld [vmem:[#allocation8 + $0x10] sm:$0xff] }
 0x174   :  { %1259 = vmatpush.bf16.msrb.mxu3 %v1872_v44  ;;  %v356_v44 = vperm.slane %v2587_v48, 2  ;;  %v2339_v48 = vld [vmem:[#allocation8 + $0x38] sm:$0xff] }
 0x175   :  { %1287 = vmatpush.bf16.msra.mxu1 %v2000_v32 }
 0x176   :  { %1272 = vmatpush.bf16.msra.mxu0 %v1944_v49  ;;  %1299 = vmatpush.bf16.msra.mxu2 %v2080_v21  ;;  %v870_v21 = vld [vmem:[%s2618_s8] sm:$0x3] }
 0x17a   :  { %1273 = vmatpush.bf16.msra.mxu0 %v1936_v60  ;;  %1300 = vmatpush.bf16.msra.mxu2 %v2072_v34 }
 0x17e   :  { %1301 = vmatpush.bf16.msra.mxu2 %v2064_v45 }
 0x1b4   :  { %v719_v40 = vpop.f32.mrf.mxu1 }
 0x1b5   :  { %v720_v24 = vadd.f32 %v719_v40, %v355_v15 }
 0x1ba   :  { %v691_v58 = vpop.f32.mrf.mxu3  ;;  %v705_v59 = vpop.f32.mrf.mxu0 }
 0x1bb   :  { %v692_v5 = vadd.f32 %v691_v58, %v354_v53 }
 0x1bc   :  { %v721_v7 = vpop.f32.mrf.mxu1 }
 0x1bd   :  { %v706_v16 = vadd.f32 %v705_v59, %v692_v5  ;;  %v722_v28 = vadd.f32 %v721_v7, %v355_v15  ;;  %v2337_v5 = vld [vmem:[#allocation8 + $0x28] sm:$0xff]  ;;  %v2335_v7 = vld [vmem:[#allocation8 + $0x18] sm:$0xff] }
 0x1be   :  { %v2343_v15 = vld [vmem:[#allocation8 + $0x58] sm:$0xff] }
 0x1bf   :  { %v794_v29 = vmax.f32 %v706_v16, 0.0 }
 0x1c0   :  { %v733_v11 = vpop.f32.mrf.mxu2 }
 0x1c1   :  { %v734_v30 = vadd.f32 %v733_v11, %v720_v24  ;;  %v2333_v11 = vld [vmem:[#allocation8 + $0x8] sm:$0xff]  ;;  %v872_v24 = vperm.slane %v870_v21, 0 }
 0x1c2   :  { %v693_v17 = vpop.f32.mrf.mxu3  ;;  %v707_v18 = vpop.f32.mrf.mxu0 }
 0x1c3   :  { %v694_v19 = vadd.f32 %v693_v17, %v354_v53  ;;  %v795_v40 = vmax.f32 %v734_v30, 0.0  ;;  %v2342_v17 = vld [vmem:[#allocation8 + $0x50] sm:$0xff] }
 0x1c4   :  { %v775_v36 = vpop.f32.mrf.mxu1 }
 0x1c5   :  { %v708_v25 = vadd.f32 %v707_v18, %v694_v19  ;;  %v776_v56 = vadd.f32 %v775_v36, %v357_v50 }
 0x1c7   :  { %v798_v31 = vmax.f32 %v708_v25, 0.0 }
 0x1c8   :  { %v735_v33 = vpop.f32.mrf.mxu2 }
 0x1c9   :  { %v802_v35 = vpack.c.bf16 %v798_v31, %v794_v29  ;;  %v736_v37 = vadd.f32 %v735_v33, %v722_v28 }
 0x1ca   :  { %v747_v41 = vpop.f32.mrf.mxu3  ;;  %v761_v42 = vpop.f32.mrf.mxu0 }
 0x1cb   :  { %v799_v43 = vmax.f32 %v736_v37, 0.0  ;;  %1204 = vmatmul.bf16.vlgmr.msra.gmra.mxu3 %v802_v35  ;;  %v748_v47 = vadd.f32 %v747_v41, %v356_v44  ;;  %v873_v41 = vperm.slane %v870_v21, 1 }
 0x1cc   :  { %v777_v54 = vpop.f32.mrf.mxu1  ;;  %1446 = vmatpush.bf16.msra.mxu3 %v2339_v48 }
 0x1cd   :  { %v803_v46 = vpack.c.bf16 %v799_v43, %v795_v40  ;;  %v762_v52 = vadd.f32 %v761_v42, %v748_v47  ;;  %v778_v59 = vadd.f32 %v777_v54, %v357_v50 }
 0x1cf   :  { %1218 = vmatmul.bf16.vlgmr.msrb.gmra.mxu0 %v803_v46  ;;  %v796_v58 = vmax.f32 %v762_v52, 0.0 }
 0x1d0   :  { %v789_v49 = vpop.f32.mrf.mxu2  ;;  %1447 = vmatpush.bf16.msra.mxu3 %v2338_v4  ;;  %1460 = vmatpush.bf16.msrb.mxu0 %v2347_v8 }
 0x1d1   :  { %v790_v60 = vadd.f32 %v789_v49, %v776_v56 }
 0x1d2   :  { %v749_v51 = vpop.f32.mrf.mxu3  ;;  %v763_v55 = vpop.f32.mrf.mxu0 }
 0x1d3   :  { %v750_v53 = vadd.f32 %v749_v51, %v356_v44  ;;  %v797_v1 = vmax.f32 %v790_v60, 0.0 }
 0x1d4   :  { %1448 = vmatpush.bf16.msra.mxu3 %v2337_v5  ;;  %1461 = vmatpush.bf16.msrb.mxu0 %v2346_v10  ;;  %v2362_v10 = vld [vmem:[#allocation2] ss:$0 sm:$0xff] }
 0x1d5   :  { %v764_v57 = vadd.f32 %v763_v55, %v750_v53 }
 0x1d7   :  { %v800_v61 = vmax.f32 %v764_v57, 0.0 }
 0x1d8   :  { %v791_v62 = vpop.f32.mrf.mxu2  ;;  %1449 = vmatpush.bf16.msra.mxu3 %v2336_v6  ;;  %1462 = vmatpush.bf16.msrb.mxu0 %v2345_v12 }
 0x1d9   :  { %v804_v63 = vpack.c.bf16 %v800_v61, %v796_v58  ;;  %v792_v0 = vadd.f32 %v791_v62, %v778_v59  ;;  %v2360_v62 = vld [vmem:[%s2620_s10] ss:$0 sm:$0xff] }
 0x1db   :  { %v801_v2 = vmax.f32 %v792_v0, 0.0  ;;  %1232 = vmatmul.bf16.vlgmr.msrb.gmra.mxu1 %v804_v63  ;;  %1260 = vmatmul.bf16.vlgmr.msrb.gmra.mxu3 %v802_v35 }
 0x1dc   :  { %1450 = vmatpush.bf16.msra.mxu3 %v2335_v7  ;;  %1463 = vmatpush.bf16.msrb.mxu0 %v2344_v14 }
 0x1dd   :  { %v805_v3 = vpack.c.bf16 %v801_v2, %v797_v1  ;;  %v2361_v2 = vld [vmem:[%s2621_s11] ss:$0 sm:$0xff] }
 0x1df   :  { %1246 = vmatmul.bf16.vlgmr.msrb.gmra.mxu2 %v805_v3  ;;  %1274 = vmatmul.bf16.vlgmr.msra.gmra.mxu0 %v803_v46 }
 0x1e0   :  { %1451 = vmatpush.bf16.msra.mxu3 %v2334_v9  ;;  %1464 = vmatpush.bf16.msrb.mxu0 %v2343_v15 }
 0x1e4   :  { %1452 = vmatpush.bf16.msra.mxu3 %v2333_v11  ;;  %1465 = vmatpush.bf16.msrb.mxu0 %v2342_v17 }
 0x1e8   :  { %1453 = vmatpush.bf16.msra.mxu3 %v2332_v13  ;;  %1466 = vmatpush.bf16.msrb.mxu0 %v2341_v20 }
 0x1eb   :  { %1288 = vmatmul.bf16.vlgmr.msra.gmra.mxu1 %v804_v63 }
 0x1ec   :  { %1467 = vmatpush.bf16.msrb.mxu0 %v2340_v23 }
 0x1ef   :  { %1302 = vmatmul.bf16.vlgmr.msra.gmra.mxu2 %v805_v3 }
 0x24c   :  { %v1219_v18 = vpop.f32.mrf.mxu0 }
 0x24e   :  { %v1205_v16 = vpop.f32.mrf.mxu3 }
 0x24f   :  { %v1206_v25 = vadd.f32 %v1205_v16, %v872_v24 }
 0x251   :  { %v1220_v30 = vadd.f32 %v1219_v18, %v1206_v25 }
 0x254   :  { %v1221_v26 = vpop.f32.mrf.mxu0 }
 0x256   :  { %v1207_v22 = vpop.f32.mrf.mxu3 }
 0x257   :  { %v1208_v29 = vadd.f32 %v1207_v22, %v872_v24 }
 0x258   :  { %v1233_v19 = vpop.f32.mrf.mxu1 }
 0x259   :  { %v1234_v32 = vadd.f32 %v1233_v19, %v1220_v30  ;;  %v1222_v33 = vadd.f32 %v1221_v26, %v1208_v29 }
 0x25c   :  { %v1275_v38 = vpop.f32.mrf.mxu0 }
 0x25e   :  { %v1261_v31 = vpop.f32.mrf.mxu3 }
 0x25f   :  { %v1262_v45 = vadd.f32 %v1261_v31, %v873_v41 }
 0x260   :  { %v1235_v27 = vpop.f32.mrf.mxu1 }
 0x261   :  { %v1236_v34 = vadd.f32 %v1235_v27, %v1222_v33  ;;  %v1276_v49 = vadd.f32 %v1275_v38, %v1262_v45 }
 0x262   :  { %v1247_v28 = vpop.f32.mrf.mxu2 }
 0x263   :  { %v1248_v35 = vadd.f32 %v1247_v28, %v1234_v32 }
 0x264   :  { %v1277_v50 = vpop.f32.mrf.mxu0 }
 0x265   :  { %v1308_v42 = vmax.f32 %v1248_v35, 0.0 }
 0x266   :  { %v1263_v44 = vpop.f32.mrf.mxu3 }
 0x267   :  { %v1264_v47 = vadd.f32 %v1263_v44, %v873_v41 }
 0x268   :  { %v1289_v39 = vpop.f32.mrf.mxu1 }
 0x269   :  { %v1290_v52 = vadd.f32 %v1289_v39, %v1276_v49  ;;  %v1278_v53 = vadd.f32 %v1277_v50, %v1264_v47 }
 0x26a   :  { %v1249_v36 = vpop.f32.mrf.mxu2 }
 0x26b   :  { %v1250_v37 = vadd.f32 %v1249_v36, %v1236_v34 }
 0x26d   :  { %v1310_v40 = vmax.f32 %v1250_v37, 0.0 }
 0x26f   :  { %v1312_v43 = vpack.c.bf16 %v1310_v40, %v1308_v42 }
 0x270   :  { %v1291_v51 = vpop.f32.mrf.mxu1 }
 0x271   :  { %1454 = vmatmul.bf16.vlgmr.msra.gmra.mxu3 %v1312_v43  ;;  %v1292_v54 = vadd.f32 %v1291_v51, %v1278_v53 }
 0x272   :  { %v1303_v46 = vpop.f32.mrf.mxu2 }
 0x273   :  { %v1304_v55 = vadd.f32 %v1303_v46, %v1290_v52 }
 0x275   :  { %v1309_v58 = vmax.f32 %v1304_v55, 0.0 }
 0x27a   :  { %v1305_v56 = vpop.f32.mrf.mxu2 }
 0x27b   :  { %v1306_v57 = vadd.f32 %v1305_v56, %v1292_v54 }
 0x27d   :  { %v1311_v59 = vmax.f32 %v1306_v57, 0.0 }
 0x27f   :  { %v1313_v60 = vpack.c.bf16 %v1311_v59, %v1309_v58 }
 0x281   :  { %1468 = vmatmul.bf16.vlgmr.msrb.gmra.mxu0 %v1313_v60 }
 0x2f4   :  { %v1455_v61 = vpop.f32.mrf.mxu3 }
 0x2f5   :  { %v1456_v63 = vadd.f32 %v2360_v62, %v1455_v61 }
 0x2fc   :  { %v1457_v48 = vpop.f32.mrf.mxu3 }
 0x2fd   :  { %v1458_v5 = vadd.f32 %v2360_v62, %v1457_v48 }
 0x2fe   :  { %v1469_v0 = vpop.f32.mrf.mxu0 }
 0x2ff   :  { %v1470_v1 = vadd.f32 %v1469_v0, %v1456_v63 }
 0x301   :  { %v1474_v3 = vmax.f32 %v1470_v1, 0.0 }
 0x303   :  { %v1480_v4 = vmul.f32 %v2361_v2, %v1474_v3 }
 0x305   :  { %1482 = vadd.xlane.f32.xlu0 %v1480_v4 }
 0x306   :  { %v1471_v6 = vpop.f32.mrf.mxu0 }
 0x307   :  { %v1472_v7 = vadd.f32 %v1471_v6, %v1458_v5 }
 0x309   :  { %v1475_v8 = vmax.f32 %v1472_v7, 0.0 }
 0x30b   :  { %v1481_v9 = vmul.f32 %v2361_v2, %v1475_v8 }
 0x30d   :  { %1484 = vadd.xlane.f32.xlu0 %v1481_v9 }
 0x378   :  { %v1483_v11 = vpop.xlane.xlu0 %1482 }
 0x379   :  { %v1490_v12 = vadd.f32 %v2362_v10, %v1483_v11 }
 0x37b   :  { %v2185_v13 = vmul.f32 -1.442695, %v1490_v12 }
 0x37d   :  { %2363 = vpow2.f32 %v2185_v13 }
 0x380   :  { %v1485_v14 = vpop.xlane.xlu0 %1484 }
 0x381   :  { %v1491_v15 = vadd.f32 %v2362_v10, %v1485_v14 }
 0x383   :  { %v2364_v16 = vpop.eup %2363  ;;  %v2186_v17 = vmul.f32 -1.442695, %v1491_v15 }
 0x384   :  { %v1498_v18 = vadd.f32 1.0, %v2364_v16 }
 0x385   :  { %2365 = vpow2.f32 %v2186_v17 }
 0x386   :  { %2367 = vrcp.f32 %v1498_v18  ;;  %v1511_v24 = vand.u32 2147483648, %v1498_v18  ;;  %v1509_v26 = vand.u32 2147483647, %v1498_v18  ;;  %vm1505_vm4 = vweird.f32 %v1498_v18 }
 0x388   :  { %v1512_v29 = vor.u32 1.1754944e-38, %v1511_v24  ;;  %vm1510_vm7 = vcmp.eq.f32.partialorder %v1509_v26, 8.507059e+37 }
 0x38b   :  { %v2366_v19 = vpop.eup %2365 }
 0x38c   :  { %v2368_v20 = vpop.eup %2367  ;;  %v1499_v21 = vadd.f32 1.0, %v2366_v19 }
 0x38d   :  { %v1501_v22 = vmul.f32 %v2368_v20, %v1498_v18  ;;  %vm1506_vm3 = vweird.f32 %v2368_v20 }
 0x38e   :  { %2369 = vrcp.f32 %v1499_v21  ;;  %vm1507_vm6 = vmor %vm1505_vm4, %vm1506_vm3  ;;  %v1526_v34 = vand.u32 2147483648, %v1499_v21  ;;  %v1524_v36 = vand.u32 2147483647, %v1499_v21  ;;  %vm1520_vm9 = vweird.f32 %v1499_v21 }
 0x38f   :  { %v1502_v23 = vsub.f32 1.0, %v1501_v22 }
 0x390   :  { %v1527_v38 = vor.u32 1.1754944e-38, %v1526_v34  ;;  %vm1525_vm11 = vcmp.eq.f32.partialorder %v1524_v36, 8.507059e+37 }
 0x391   :  { %v1503_v25 = vmul.f32 %v2368_v20, %v1502_v23 }
 0x393   :  { %v1504_v27 = vadd.f32 %v2368_v20, %v1503_v25 }
 0x394   :  { %v2370_v28 = vpop.eup %2369 }
 0x395   :  { %v1508_v30 = vsel %vm1507_vm6, %v2368_v20, %v1504_v27  ;;  %v1516_v31 = vmul.f32 %v2370_v28, %v1499_v21  ;;  %vm1521_vm8 = vweird.f32 %v2370_v28 }
 0x396   :  { %v1513_v32 = vsel %vm1510_vm7, %v1512_v29, %v1508_v30  ;;  %vm1522_vm10 = vmor %vm1520_vm9, %vm1521_vm8 }
 0x397   :  { %1531 = vst.msk [vmem:[%s2623_s13] sm:$0xff] %vm1530_vm5, %v1513_v32  ;;  %v1517_v33 = vsub.f32 1.0, %v1516_v31 }
 0x399   :  { %v1518_v35 = vmul.f32 %v2370_v28, %v1517_v33 }
 0x39b   :  { %v1519_v37 = vadd.f32 %v2370_v28, %v1518_v35 }
 0x39d   :  { %v1523_v39 = vsel %vm1522_vm10, %v2370_v28, %v1519_v37 }
 0x39e   :  { %v1528_v41 = vsel %vm1525_vm11, %v1527_v38, %v1523_v39 }
 0x39f   :  { %1532 = vst.msk [vmem:[%s2623_s13 + $0x8] sm:$0xff] %vm1530_vm5, %v1528_v41 }
 0x3a0   :  { %1537 = vsyncpa [#allocation4], 1 }
 0x3a1   :  { %1538 = vsyncpa [#allocation6], 1 }
 0x3a2   :  { %1539 = vsyncpa [#allocation9], 1 }

</bundles_post_ra>
